<compile_context>
chip_gen: v5e
topology: v5e:2x2
jax: 0.10.0
libtpu: 0.0.40
codegen_flags: <defaults>
</compile_context>

<pallas_src>
import jax
import jax.numpy as jnp
import numpy as np
from jax.experimental import pallas as pl
from jax.experimental.pallas import tpu as pltpu

IMG = 784        # 28*28, fixed by the reference module
IMG_PAD = 896    # 7*128 -> lane-dense x loads / clean MXU K tiling
HID = 24         # enc1 hidden width, fixed by the reference module


def _round_up(n, m):
    return (n + m - 1) // m * m


# ----------------------------------------------------------------------------
# Kernel
# ----------------------------------------------------------------------------
def encoder_kernel(x_ref, w1_ref, b1_ref, wml_ref, bml_ref, eps_ref,
                   mulv_ref, enc_ref):
    feat = eps_ref.shape[1]

    # enc1 + relu   (x is zero-padded to 896 lanes; the extra K rows of w1 are 0)
    h = jnp.dot(x_ref[...], w1_ref[...],
                preferred_element_type=jnp.float32) + b1_ref[...]
    h = jnp.maximum(h, 0.0)

    # Fused (enc2 -> mu) || (enc2 -> logvar): a single (HID, 2*feat) matmul.
    ml = jnp.dot(h, wml_ref[...],
                 preferred_element_type=jnp.float32) + bml_ref[...]
    mulv_ref[...] = ml                      # lane-packed [mu | logvar] output

    mu = ml[:, :feat]
    lv = ml[:, feat:]
    # reparameterize: eps is the single (features,) randn draw, broadcast over batch.
    enc_ref[...] = eps_ref[...] * jnp.exp(0.5 * lv) + mu


# ----------------------------------------------------------------------------
# Host-side parameter prep (weight folding + padding)
# ----------------------------------------------------------------------------
def fold_params(p):
    """Pad w_enc1 to 896 rows and fold enc2 into the mu/logvar heads."""
    w1 = jnp.pad(p["w_enc1"], ((0, IMG_PAD - IMG), (0, 0)))          # (896, 24)
    b1 = p["b_enc1"]                                                  # (1, 24)
    w_mu_f = p["w_enc2"] @ p["w_mu"]                                  # (24, feat)
    b_mu_f = p["b_enc2"] @ p["w_mu"] + p["b_mu"]                      # (1, feat)
    w_lv_f = p["w_enc2"] @ p["w_lv"]
    b_lv_f = p["b_enc2"] @ p["w_lv"] + p["b_lv"]
    w_ml = jnp.concatenate([w_mu_f, w_lv_f], axis=1)                  # (24, 2*feat)
    b_ml = jnp.concatenate([b_mu_f, b_lv_f], axis=1)                  # (1, 2*feat)
    return w1, b1, w_ml, b_ml


# ----------------------------------------------------------------------------
# Wrapper
# ----------------------------------------------------------------------------
def encoder_forward(x, params, eps, *, tb=1024):
    """x: (B, 784) f32.  eps: (features,) f32 -- the torch.randn(features) draw.
    Returns (mu, logvar, encoding), each (B, features) f32."""
    B, img = x.shape
    assert img == IMG
    feat = params["w_mu"].shape[0]

    w1, b1, w_ml, b_ml = fold_params(params)
    eps2 = eps.reshape(1, feat).astype(jnp.float32)

    # Batch tile: multiple of 8 sublanes, capped by `tb` (sized well under the
    # 32 MiB scoped VMEM budget on v7x: 2 * TB*896*4 B of double-buffered x
    # plus ~90 KB of resident weights).
    TB = min(tb, _round_up(B, 8))
    B_pad = _round_up(B, TB)
    x_pad = jnp.pad(x, ((0, B_pad - B), (0, IMG_PAD - IMG)))
    grid = (B_pad // TB,)

    row = lambda i: (i, 0)      # batch-tiled arrays
    const = lambda i: (0, 0)    # VMEM-resident weights / biases / eps

    flops = 2 * B_pad * (IMG_PAD * HID + HID * 2 * feat) + 6 * B_pad * feat
    bytes_accessed = 4 * (x_pad.size + w1.size + b1.size + w_ml.size
                          + b_ml.size + eps2.size + B_pad * 3 * feat)

    mulv, enc = pl.pallas_call(
        encoder_kernel,
        out_shape=(jax.ShapeDtypeStruct((B_pad, 2 * feat), jnp.float32),
                   jax.ShapeDtypeStruct((B_pad, feat), jnp.float32)),
        grid_spec=pltpu.PrefetchScalarGridSpec(
            num_scalar_prefetch=0,
            grid=grid,
            in_specs=[
                pl.BlockSpec((TB, IMG_PAD), row),       # x tile (pipelined)
                pl.BlockSpec((IMG_PAD, HID), const),    # w_enc1 (resident)
                pl.BlockSpec((1, HID), const),          # b_enc1
                pl.BlockSpec((HID, 2 * feat), const),   # fused [w_mu | w_lv]
                pl.BlockSpec((1, 2 * feat), const),     # fused [b_mu | b_lv]
                pl.BlockSpec((1, feat), const),         # eps
            ],
            out_specs=(pl.BlockSpec((TB, 2 * feat), row),   # [mu | logvar]
                       pl.BlockSpec((TB, feat), row)),      # encoding
        ),
        compiler_params=pltpu.CompilerParams(
            dimension_semantics=("parallel",),
            vmem_limit_bytes=32 * 1024 * 1024,
        ),
        cost_estimate=pl.CostEstimate(
            flops=int(flops),
            transcendentals=int(B_pad * feat),
            bytes_accessed=int(bytes_accessed),
        ),
    )(x_pad, w1, b1, w_ml, b_ml, eps2)

    mu = mulv[:B, :feat]
    logvar = mulv[:B, feat:]
    return mu, logvar, enc[:B]


# ----------------------------------------------------------------------------
# Init + pure-JAX reference (unfolded path, matches the PyTorch forward)
# ----------------------------------------------------------------------------
def init_linear(key, fan_in, fan_out):
    """PyTorch nn.Linear default init; weight returned transposed as (in, out)."""
    kw, kb = jax.random.split(key)
    bound = 1.0 / np.sqrt(fan_in)
    w = jax.random.uniform(kw, (fan_in, fan_out), jnp.float32, -bound, bound)
    b = jax.random.uniform(kb, (1, fan_out), jnp.float32, -bound, bound)
    return w, b


def init_encoder_params(key, features):
    keys = jax.random.split(key, 4)
    p = {}
    p["w_enc1"], p["b_enc1"] = init_linear(keys[0], IMG, HID)
    p["w_enc2"], p["b_enc2"] = init_linear(keys[1], HID, features)
    p["w_mu"],   p["b_mu"]   = init_linear(keys[2], features, features)
    p["w_lv"],   p["b_lv"]   = init_linear(keys[3], features, features)
    return p


def encoder_reference(x, p, eps):
    h = jax.nn.relu(x @ p["w_enc1"] + p["b_enc1"])
    h = h @ p["w_enc2"] + p["b_enc2"]
    mu = h @ p["w_mu"] + p["b_mu"]
    lv = h @ p["w_lv"] + p["b_lv"]
    enc = eps * jnp.exp(0.5 * lv) + mu
    return mu, lv, enc


if __name__ == "__main__":
    key = jax.random.PRNGKey(0)
    k_params, k_x, k_eps = jax.random.split(key, 3)

    batch, features = 256, 16
    params = init_encoder_params(k_params, features)
    x = jax.random.normal(k_x, (batch, IMG), jnp.float32)
    eps = jax.random.normal(k_eps, (features,), jnp.float32)   # torch.randn(features)

    # TB=128 -> 2 grid steps at this small demo batch (exercises the pipeline).
    mu, logvar, enc = jax.block_until_ready(
        encoder_forward(x, params, eps, tb=128))

    mu_r, lv_r, enc_r = encoder_reference(x, params, eps.reshape(1, features))
    np.testing.assert_allclose(np.asarray(mu), np.asarray(mu_r), rtol=1e-4, atol=1e-4)
    np.testing.assert_allclose(np.asarray(logvar), np.asarray(lv_r), rtol=1e-4, atol=1e-4)
    np.testing.assert_allclose(np.asarray(enc), np.asarray(enc_r), rtol=1e-4, atol=1e-4)

    print("KERNEL_OK")
</pallas_src>

<mosaic_0001>
module attributes {stable_mosaic.version = 11 : i64} {
  func.func @encoder_kernel(%arg0: i32, %arg1: memref<128x896xf32, #tpu.memory_space<vmem>>, %arg2: memref<896x24xf32, #tpu.memory_space<vmem>>, %arg3: memref<1x24xf32, #tpu.memory_space<vmem>>, %arg4: memref<24x32xf32, #tpu.memory_space<vmem>>, %arg5: memref<1x32xf32, #tpu.memory_space<vmem>>, %arg6: memref<1x16xf32, #tpu.memory_space<vmem>>, %arg7: memref<128x32xf32, #tpu.memory_space<vmem>>, %arg8: memref<128x16xf32, #tpu.memory_space<vmem>>) attributes {dimension_semantics = [#tpu.dimension_semantics<parallel>], iteration_bounds = array<i64: 2>, scalar_prefetch = 0 : i64, scratch_operands = 0 : i64, tpu.core_type = #tpu.core_type<tc>, window_params = [{transform_indices = @transform_0, window_bounds = array<i64: 128, 896>}, {pipeline_mode = #tpu.pipeline_mode<synchronous>, transform_indices = @transform_1, window_bounds = array<i64: 896, 24>}, {pipeline_mode = #tpu.pipeline_mode<synchronous>, transform_indices = @transform_2, window_bounds = array<i64: 1, 24>}, {pipeline_mode = #tpu.pipeline_mode<synchronous>, transform_indices = @transform_3, window_bounds = array<i64: 24, 32>}, {pipeline_mode = #tpu.pipeline_mode<synchronous>, transform_indices = @transform_4, window_bounds = array<i64: 1, 32>}, {pipeline_mode = #tpu.pipeline_mode<synchronous>, transform_indices = @transform_5, window_bounds = array<i64: 1, 16>}, {transform_indices = @transform_6, window_bounds = array<i64: 128, 32>}, {transform_indices = @transform_7, window_bounds = array<i64: 128, 16>}]} {
    %c0 = arith.constant 0 : index
    %c0_0 = arith.constant 0 : index
    %0 = vector.load %arg1[%c0, %c0_0] : memref<128x896xf32, #tpu.memory_space<vmem>>, vector<128x896xf32>
    %c0_1 = arith.constant 0 : index
    %c0_2 = arith.constant 0 : index
    %1 = vector.load %arg2[%c0_1, %c0_2] : memref<896x24xf32, #tpu.memory_space<vmem>>, vector<896x24xf32>
    %cst = arith.constant dense<0.000000e+00> : vector<128x24xf32>
    %2 = tpu.matmul %0, %1, %cst {dimension_numbers = #tpu.dot_dimension_numbers<[1], [0], [0], [1], [0, 0, 1, 1], [], []>} : vector<128x896xf32>, vector<896x24xf32>, vector<128x24xf32> -> vector<128x24xf32>
    %c0_3 = arith.constant 0 : index
    %c0_4 = arith.constant 0 : index
    %3 = vector.load %arg3[%c0_3, %c0_4] : memref<1x24xf32, #tpu.memory_space<vmem>>, vector<1x24xf32>
    %4 = vector.broadcast %3 : vector<1x24xf32> to vector<128x24xf32>
    %5 = arith.addf %2, %4 : vector<128x24xf32>
    %cst_5 = arith.constant 0.000000e+00 : f32
    %6 = vector.broadcast %cst_5 : f32 to vector<128x24xf32>
    %7 = arith.maximumf %5, %6 : vector<128x24xf32>
    %c0_6 = arith.constant 0 : index
    %c0_7 = arith.constant 0 : index
    %8 = vector.load %arg4[%c0_6, %c0_7] : memref<24x32xf32, #tpu.memory_space<vmem>>, vector<24x32xf32>
    %cst_8 = arith.constant dense<0.000000e+00> : vector<128x32xf32>
    %9 = tpu.matmul %7, %8, %cst_8 {dimension_numbers = #tpu.dot_dimension_numbers<[1], [0], [0], [1], [0, 0, 1, 1], [], []>} : vector<128x24xf32>, vector<24x32xf32>, vector<128x32xf32> -> vector<128x32xf32>
    %c0_9 = arith.constant 0 : index
    %c0_10 = arith.constant 0 : index
    %10 = vector.load %arg5[%c0_9, %c0_10] : memref<1x32xf32, #tpu.memory_space<vmem>>, vector<1x32xf32>
    %11 = vector.broadcast %10 : vector<1x32xf32> to vector<128x32xf32>
    %12 = arith.addf %9, %11 : vector<128x32xf32>
    %c0_11 = arith.constant 0 : index
    %c0_12 = arith.constant 0 : index
    %13 = vector.load %arg7[%c0_11, %c0_12] : memref<128x32xf32, #tpu.memory_space<vmem>>, vector<128x32xf32>
    tpu.vector_store %arg7[%c0_11, %c0_12], %12 {strides = array<i32>} : memref<128x32xf32, #tpu.memory_space<vmem>>, vector<128x32xf32>,
    %14 = vector.extract_strided_slice %12 {offsets = [0, 0], sizes = [128, 16], strides = [1, 1]} : vector<128x32xf32> to vector<128x16xf32>
    %15 = vector.extract_strided_slice %12 {offsets = [0, 16], sizes = [128, 16], strides = [1, 1]} : vector<128x32xf32> to vector<128x16xf32>
    %c0_13 = arith.constant 0 : index
    %c0_14 = arith.constant 0 : index
    %16 = vector.load %arg6[%c0_13, %c0_14] : memref<1x16xf32, #tpu.memory_space<vmem>>, vector<1x16xf32>
    %cst_15 = arith.constant 5.000000e-01 : f32
    %17 = vector.broadcast %cst_15 : f32 to vector<128x16xf32>
    %18 = arith.mulf %17, %15 : vector<128x16xf32>
    %19 = math.exp %18 : vector<128x16xf32>
    %20 = vector.broadcast %16 : vector<1x16xf32> to vector<128x16xf32>
    %21 = arith.mulf %20, %19 : vector<128x16xf32>
    %22 = arith.addf %21, %14 : vector<128x16xf32>
    %c0_16 = arith.constant 0 : index
    %c0_17 = arith.constant 0 : index
    %23 = vector.load %arg8[%c0_16, %c0_17] : memref<128x16xf32, #tpu.memory_space<vmem>>, vector<128x16xf32>
    tpu.vector_store %arg8[%c0_16, %c0_17], %22 {strides = array<i32>} : memref<128x16xf32, #tpu.memory_space<vmem>>, vector<128x16xf32>,
    return
  }
  func.func @transform_0(%arg0: i32) -> (i32, i32) {
    %c0_i32 = arith.constant 0 : i32
    %c0_i32_0 = arith.constant 0 : i32
    return %arg0, %c0_i32 : i32, i32
  }
  func.func @transform_1(%arg0: i32) -> (i32, i32) {
    %c0_i32 = arith.constant 0 : i32
    %c0_i32_0 = arith.constant 0 : i32
    %c0_i32_1 = arith.constant 0 : i32
    return %c0_i32, %c0_i32_0 : i32, i32
  }
  func.func @transform_2(%arg0: i32) -> (i32, i32) {
    %c0_i32 = arith.constant 0 : i32
    %c0_i32_0 = arith.constant 0 : i32
    %c0_i32_1 = arith.constant 0 : i32
    return %c0_i32, %c0_i32_0 : i32, i32
  }
  func.func @transform_3(%arg0: i32) -> (i32, i32) {
    %c0_i32 = arith.constant 0 : i32
    %c0_i32_0 = arith.constant 0 : i32
    %c0_i32_1 = arith.constant 0 : i32
    return %c0_i32, %c0_i32_0 : i32, i32
  }
  func.func @transform_4(%arg0: i32) -> (i32, i32) {
    %c0_i32 = arith.constant 0 : i32
    %c0_i32_0 = arith.constant 0 : i32
    %c0_i32_1 = arith.constant 0 : i32
    return %c0_i32, %c0_i32_0 : i32, i32
  }
  func.func @transform_5(%arg0: i32) -> (i32, i32) {
    %c0_i32 = arith.constant 0 : i32
    %c0_i32_0 = arith.constant 0 : i32
    %c0_i32_1 = arith.constant 0 : i32
    return %c0_i32, %c0_i32_0 : i32, i32
  }
  func.func @transform_6(%arg0: i32) -> (i32, i32) {
    %c0_i32 = arith.constant 0 : i32
    %c0_i32_0 = arith.constant 0 : i32
    return %arg0, %c0_i32 : i32, i32
  }
  func.func @transform_7(%arg0: i32) -> (i32, i32) {
    %c0_i32 = arith.constant 0 : i32
    %c0_i32_0 = arith.constant 0 : i32
    return %arg0, %c0_i32 : i32, i32
  }
}

</mosaic_0001>

<bundles_post_ra>
// kernel: tpu_custom_call.1
= control target key start
LH: loop header
LB: loop body
LE: loop exit
PB: predicated region body
PF: predicated region fallthrough
CT: control target
= control target key end

     0   :  { %13 = vsyncpa [#allocation3], 0  ;;  %s2533_s0 = inlined_call_operand.hbm [shape: f32[256,896], index: 0, kind: input, shape index: {}]   ;;  %s2534_s1 = inlined_call_operand.vmem [shape: f32[896,24], index: 1, kind: input, shape index: {}]   ;;  %s2535_s2 = inlined_call_operand.vmem [shape: f32[1,24], index: 2, kind: input, shape index: {}]   ;;  %s2536_s3 = inlined_call_operand.vmem [shape: f32[24,32], index: 3, kind: input, shape index: {}]   ;;  %s2537_s4 = inlined_call_operand.vmem [shape: f32[1,32], index: 4, kind: input, shape index: {}]   ;;  %s2538_s5 = inlined_call_operand.vmem [shape: f32[1,16], index: 5, kind: input, shape index: {}]   ;;  %s2539_s6 = inlined_call_operand.vmem [shape: f32[256,32], index: 6, kind: output, shape index: {0}]   ;;  %s2540_s7 = inlined_call_operand.vmem [shape: f32[256,16], index: 7, kind: output, shape index: {1}]  }
   0x1   :  { %15 = vsyncpa [#allocation3 + $0x1], 0  ;;  %s1640_s24 = smov 0   ;;  %s1642_s25 = smov 0  }
   0x2   :  { %s1644_s26 = smov 0   ;;  %s1646_s27 = smov 0  }
   0x3 LB: > { %s1421_s28 = sadd.s32 4294967295, %s1595_s27   ;;  %s1660_s29 = sadd.s32 1, %s1595_s27   ;;  %s1595_s27 = sphi %s1646_s27, %s2546_s27   ;;  %s1591_s26 = sphi %s1644_s26, %s2545_s26   ;;  %s1587_s25 = sphi %s1642_s25, %s2544_s25   ;;  %s1583_s24 = sphi %s1640_s24, %s2543_s24  }
   0x4   : > { %s25_s30 = ssub.s32 %s1595_s27, %s1660_s29  ;;  %s28_s8 = sadd.s32 1, %s1591_s26 }
   0x5   : > { %p26_p0 = scmp.eq.s32.totalorder %s25_s30, 0  ;;  %p35_p1 = scmp.ne.s32.totalorder %s1591_s26, %s1587_s25 }
   0x6   : > { %p36_p2 = scmp.eq.s32.totalorder %s1595_s27, 0  ;;  %p41_p3 = scmp.ne.s32.totalorder %s1587_s25, %s1583_s24 }
   0x7   : > { %s1670_s9 = scalar_select %p26_p0, %s1591_s26, %s28_s8  }
   0x8   : > { %p37_p4 = por %p36_p2, %p35_p1  ;;  %p42_p5 = scmp.eq.s32.totalorder %s1421_s28, 0 }
   0x9   : > { %p1460_p6 = scmp.lt.s32.totalorder %s1595_s27, 2  ;;  %s237_s11 = sand.u32 1, %s1591_s26  }
   0xa   : > { %p1675_p7 = por %p42_p5, %p41_p3  ;;  %s1451_s12 = smul.u32 896, %s237_s11 }
   0xb   : > { %s1452_s13 = smul.u32 896, %s1595_s27  ;;  %p1681_p8 = pnand %p1460_p6, %p37_p4 }
   0xc   : > { %s241_s18 = scalar_lea.vmem [#allocation2], %s1451_s12  ;;  %p1428_p9 = scmp.ge.s32.totalorder %s1595_s27, 1 }
   0xd   : > { %s247_s17 = scalar_lea.hbm %s2533_s0, %s1452_s13  ;;  %s250_s19 = sshll.u32 %s241_s18, 4  ;;  %s251_s19 = int_to_ptr.vmem [resolvable:$true] %s250_s19 }
   0xe   : > { %s248_s20 = sshll.u32 %s247_s17, 4  ;;  %s238_s21 = scalar_lea.sflag [#allocation3], %s237_s11  ;;  %s249_s20 = int_to_ptr.hbm [resolvable:$true] %s248_s20 }
   0xf   : > { %s1531_s22 = sshra.s32 %s249_s20, 4  ;;  %p1535_p11 = pneg %p1681_p8  ;;  %s1532_s22 = int_to_ptr.hbm [resolvable:$true] %s1531_s22 }
  0x10   : > { %s1533_s23 = scalar_lea.hbm %s1532_s22, 896  ;;  %s1538_s8 = scalar_lea.hbm %s2533_s0, 1792 }
  0x11   : > { %p1534_p10 = scmp.ne.s32.totalorder %s1532_s22, %s1533_s23  ;;  %p1539_p0 = scmp.lt.s32.totalorder %s1532_s22, %s2533_s0 }
  0x12   : > { %p1540_p1 = scmp.lt.s32.totalorder %s1538_s8, %s1533_s23 }
  0x13   : > { %p1536_p12 = pnand %p1535_p11, %p1534_p10 }
  0x14   : > { %p1541_p2 = por %p1540_p1, %p1539_p0 }
  0x15   : > { %p1537_p13 = pneg %p1536_p12 }
  0x17   : > { %p1542_p3 = pnand %p1541_p2, %p1537_p13 }
  0x19   : > { %1545 = shalt.err (!%p1542_p3)
}
  0x1a   : > { %s1597_s11 = smov 896   ;;  %s1598_s15 = smov 56  }
  0x1b   : > { %1459 = dma.hbm_to_vmem [thread:$0]  (!%p1681_p8), %s249_s20, 14336, %s251_s19, %s238_s21, %s1597_s11, %s1597_s11, %s1598_s15  }
  0x1c   : > { %p258_p4 = scmp.lt.s32.totalorder %s1595_s27, 3 }
  0x1e   : > { %p259_p5 = pnand %p1428_p9, %p258_p4 }
  0x1f   : > { %s264_s16 = sand.u32 (!%p259_p5), 1, %s1587_s25  }
  0x20   : > { %262 = sbr.rel (%p259_p5) target bundleno = 720 (0x2d0), region = 44  ;;  %s265_s18 = scalar_lea.sflag (!%p259_p5), [#allocation3], %s264_s16 }
  0x21   : > { %s1453_s17 = smul.u32 (!%p259_p5), 896, %s264_s16 }
  0x23   : > { %s1703_s22 = scalar_lea.vmem (!%p259_p5), [#allocation2], %s1453_s17 }
  0x25   : > { %1578 = dma.done.wait (%p1675_p7), %s265_s18, 14336  }
  0x26   : > { %1580 = vsyncadd (%p1675_p7), %s265_s18, 4294952960  ;;  %v445_v0 = vld [vmem:[%s2534_s1 + $0x78] sm:$0xff]  ;;  %v444_v2 = vld [vmem:[%s2534_s1 + $0x70] sm:$0xff]  ;;  %vm1024_vm0 = vcmask 195584   ;;  %vm1138_vm1 = vcmask 261120   ;;  %vm1303_vm2 = vcmask 130048  }
  0x27   : > { %v477_v1 = vld [vmem:[%s2534_s1 + $0x178] sm:$0xff]  ;;  %546 = vmatpush.msra.mxu0 %v445_v0  ;;  %v476_v4 = vld [vmem:[%s2534_s1 + $0x170] sm:$0xff]  ;;  %v443_v6 = vld [vmem:[%s2534_s1 + $0x68] sm:$0xff] }
  0x28   : > { %676 = vmatpush.msra.mxu2 %v477_v1  ;;  %v461_v3 = vld [vmem:[%s2534_s1 + $0xf8] sm:$0xff]  ;;  %v460_v7 = vld [vmem:[%s2534_s1 + $0xf0] sm:$0xff]  ;;  %v475_v8 = vld [vmem:[%s2534_s1 + $0x168] sm:$0xff] }
  0x29   : > { %v493_v5 = vld [vmem:[%s2534_s1 + $0x1f8] sm:$0xff]  ;;  %611 = vmatpush.msra.mxu1 %v461_v3  ;;  %547 = vmatpush.msra.mxu0 %v444_v2  ;;  %v492_v9 = vld [vmem:[%s2534_s1 + $0x1f0] sm:$0xff]  ;;  %v459_v10 = vld [vmem:[%s2534_s1 + $0xe8] sm:$0xff] }
  0x2a   : > { %741 = vmatpush.msra.mxu3 %v493_v5  ;;  %677 = vmatpush.msra.mxu2 %v476_v4  ;;  %v442_v11 = vld [vmem:[%s2534_s1 + $0x60] sm:$0xff]  ;;  %v491_v13 = vld [vmem:[%s2534_s1 + $0x1e8] sm:$0xff]  ;;  %v441_v16 = vld [vmem:[%s2534_s1 + $0x58] sm:$0xff] }
  0x2b   : > { %612 = vmatpush.msra.mxu1 %v460_v7  ;;  %v474_v12 = vld [vmem:[%s2534_s1 + $0x160] sm:$0xff]  ;;  %548 = vmatpush.msra.mxu0 %v443_v6  ;;  %v473_v17 = vld [vmem:[%s2534_s1 + $0x158] sm:$0xff]  ;;  %v440_v20 = vld [vmem:[%s2534_s1 + $0x50] sm:$0xff] }
  0x2c   : > { %742 = vmatpush.msra.mxu3 %v492_v9  ;;  %678 = vmatpush.msra.mxu2 %v475_v8  ;;  %v458_v14 = vld [vmem:[%s2534_s1 + $0xe0] sm:$0xff]  ;;  %v457_v18 = vld [vmem:[%s2534_s1 + $0xd8] sm:$0xff]  ;;  %v472_v21 = vld [vmem:[%s2534_s1 + $0x150] sm:$0xff] }
  0x2d   : > { %v490_v15 = vld [vmem:[%s2534_s1 + $0x1e0] sm:$0xff]  ;;  %613 = vmatpush.msra.mxu1 %v459_v10  ;;  %549 = vmatpush.msra.mxu0 %v442_v11  ;;  %v489_v19 = vld [vmem:[%s2534_s1 + $0x1d8] sm:$0xff]  ;;  %v456_v22 = vld [vmem:[%s2534_s1 + $0xd0] sm:$0xff] }
  0x2e   : > { %743 = vmatpush.msra.mxu3 %v491_v13  ;;  %679 = vmatpush.msra.mxu2 %v474_v12  ;;  %v488_v23 = vld [vmem:[%s2534_s1 + $0x1d0] sm:$0xff]  ;;  %v439_v24 = vld [vmem:[%s2534_s1 + $0x48] sm:$0xff]  ;;  %v438_v28 = vld [vmem:[%s2534_s1 + $0x40] sm:$0xff] }
  0x2f   : > { %614 = vmatpush.msra.mxu1 %v458_v14  ;;  %550 = vmatpush.msra.mxu0 %v441_v16  ;;  %v471_v25 = vld [vmem:[%s2534_s1 + $0x148] sm:$0xff]  ;;  %v470_v29 = vld [vmem:[%s2534_s1 + $0x140] sm:$0xff]  ;;  %v437_v32 = vld [vmem:[%s2534_s1 + $0x38] sm:$0xff] }
  0x30   : > { %744 = vmatpush.msra.mxu3 %v490_v15  ;;  %680 = vmatpush.msra.mxu2 %v473_v17  ;;  %v455_v26 = vld [vmem:[%s2534_s1 + $0xc8] sm:$0xff]  ;;  %v454_v30 = vld [vmem:[%s2534_s1 + $0xc0] sm:$0xff]  ;;  %v469_v33 = vld [vmem:[%s2534_s1 + $0x138] sm:$0xff] }
  0x31   : > { %615 = vmatpush.msra.mxu1 %v457_v18  ;;  %551 = vmatpush.msra.mxu0 %v440_v20  ;;  %v487_v27 = vld [vmem:[%s2534_s1 + $0x1c8] sm:$0xff]  ;;  %v486_v31 = vld [vmem:[%s2534_s1 + $0x1c0] sm:$0xff]  ;;  %v453_v34 = vld [vmem:[%s2534_s1 + $0xb8] sm:$0xff] }
  0x32   : > { %745 = vmatpush.msra.mxu3 %v489_v19  ;;  %681 = vmatpush.msra.mxu2 %v472_v21  ;;  %v485_v35 = vld [vmem:[%s2534_s1 + $0x1b8] sm:$0xff]  ;;  %v436_v36 = vld [vmem:[%s2534_s1 + $0x30] sm:$0xff]  ;;  %v435_v40 = vld [vmem:[%s2534_s1 + $0x28] sm:$0xff] }
  0x33   : > { %616 = vmatpush.msra.mxu1 %v456_v22  ;;  %552 = vmatpush.msra.mxu0 %v439_v24  ;;  %v468_v37 = vld [vmem:[%s2534_s1 + $0x130] sm:$0xff]  ;;  %v467_v41 = vld [vmem:[%s2534_s1 + $0x128] sm:$0xff]  ;;  %v434_v44 = vld [vmem:[%s2534_s1 + $0x20] sm:$0xff] }
  0x34   : > { %746 = vmatpush.msra.mxu3 %v488_v23  ;;  %682 = vmatpush.msra.mxu2 %v471_v25  ;;  %v452_v38 = vld [vmem:[%s2534_s1 + $0xb0] sm:$0xff]  ;;  %v451_v42 = vld [vmem:[%s2534_s1 + $0xa8] sm:$0xff]  ;;  %v466_v45 = vld [vmem:[%s2534_s1 + $0x120] sm:$0xff] }
  0x35   : > { %617 = vmatpush.msra.mxu1 %v455_v26  ;;  %553 = vmatpush.msra.mxu0 %v438_v28  ;;  %v484_v39 = vld [vmem:[%s2534_s1 + $0x1b0] sm:$0xff]  ;;  %v483_v43 = vld [vmem:[%s2534_s1 + $0x1a8] sm:$0xff]  ;;  %v450_v46 = vld [vmem:[%s2534_s1 + $0xa0] sm:$0xff] }
  0x36   : > { %747 = vmatpush.msra.mxu3 %v487_v27  ;;  %683 = vmatpush.msra.mxu2 %v470_v29  ;;  %v482_v47 = vld [vmem:[%s2534_s1 + $0x1a0] sm:$0xff]  ;;  %v433_v48 = vld [vmem:[%s2534_s1 + $0x18] sm:$0xff]  ;;  %v432_v52 = vld [vmem:[%s2534_s1 + $0x10] sm:$0xff] }
  0x37   : > { %618 = vmatpush.msra.mxu1 %v454_v30  ;;  %554 = vmatpush.msra.mxu0 %v437_v32  ;;  %v465_v49 = vld [vmem:[%s2534_s1 + $0x118] sm:$0xff]  ;;  %v464_v53 = vld [vmem:[%s2534_s1 + $0x110] sm:$0xff]  ;;  %v431_v56 = vld [vmem:[%s2534_s1 + $0x8] sm:$0xff] }
  0x38   : > { %748 = vmatpush.msra.mxu3 %v486_v31  ;;  %684 = vmatpush.msra.mxu2 %v469_v33  ;;  %v449_v50 = vld [vmem:[%s2534_s1 + $0x98] sm:$0xff]  ;;  %v448_v54 = vld [vmem:[%s2534_s1 + $0x90] sm:$0xff]  ;;  %v463_v57 = vld [vmem:[%s2534_s1 + $0x108] sm:$0xff] }
  0x39   : > { %619 = vmatpush.msra.mxu1 %v453_v34  ;;  %555 = vmatpush.msra.mxu0 %v436_v36  ;;  %v481_v51 = vld [vmem:[%s2534_s1 + $0x198] sm:$0xff]  ;;  %v480_v55 = vld [vmem:[%s2534_s1 + $0x190] sm:$0xff]  ;;  %v447_v58 = vld [vmem:[%s2534_s1 + $0x88] sm:$0xff] }
  0x3a   : > { %749 = vmatpush.msra.mxu3 %v485_v35  ;;  %685 = vmatpush.msra.mxu2 %v468_v37  ;;  %v479_v59 = vld [vmem:[%s2534_s1 + $0x188] sm:$0xff]  ;;  %v430_v60 = vld [vmem:[%s2534_s1] sm:$0xff]  ;;  %v320_v63 = vld [vmem:[%s1703_s22 + $0x10] sm:$0xff] }
  0x3b   : > { %620 = vmatpush.msra.mxu1 %v452_v38  ;;  %556 = vmatpush.msra.mxu0 %v435_v40  ;;  %v462_v61 = vld [vmem:[%s2534_s1 + $0x100] sm:$0xff]  ;;  %v541_v0 = vld [vmem:[%s2534_s1 + $0x378] sm:$0xff]  ;;  %v319_v3 = vld [vmem:[%s1703_s22 + $0x8] sm:$0xff] }
  0x3c   : > { %750 = vmatpush.msra.mxu3 %v484_v39  ;;  %686 = vmatpush.msra.mxu2 %v467_v41  ;;  %v318_v62 = vld [vmem:[%s1703_s22] sm:$0xff]  ;;  %v321_v4 = vld [vmem:[%s1703_s22 + $0x18] sm:$0xff]  ;;  %v540_v7 = vld [vmem:[%s2534_s1 + $0x370] sm:$0xff] }
  0x3d   : > { %621 = vmatpush.msra.mxu1 %v451_v42  ;;  %557 = vmatpush.msra.mxu0 %v434_v44  ;;  %v446_v1 = vld [vmem:[%s2534_s1 + $0x80] sm:$0xff]  ;;  %v509_v5 = vld [vmem:[%s2534_s1 + $0x278] sm:$0xff]  ;;  %v508_v8 = vld [vmem:[%s2534_s1 + $0x270] sm:$0xff] }
  0x3e   : > { %751 = vmatpush.msra.mxu3 %v483_v43  ;;  %687 = vmatpush.msra.mxu2 %v466_v45  ;;  %v478_v2 = vld [vmem:[%s2534_s1 + $0x180] sm:$0xff]  ;;  %v525_v6 = vld [vmem:[%s2534_s1 + $0x2f8] sm:$0xff]  ;;  %v524_v9 = vld [vmem:[%s2534_s1 + $0x2f0] sm:$0xff] }
  0x3f   : > { %622 = vmatpush.msra.mxu1 %v450_v46  ;;  %558 = vmatpush.msra.mxu0 %v433_v48  ;;  %v539_v10 = vld [vmem:[%s2534_s1 + $0x368] sm:$0xff]  ;;  %v325_v12 = vld [vmem:[%s1703_s22 + $0x38] sm:$0xff]  ;;  %v538_v15 = vld [vmem:[%s2534_s1 + $0x360] sm:$0xff] }
  0x40   : > { %752 = vmatpush.msra.mxu3 %v482_v47  ;;  %688 = vmatpush.msra.mxu2 %v465_v49  ;;  %v507_v11 = vld [vmem:[%s2534_s1 + $0x268] sm:$0xff]  ;;  %v326_v16 = vld [vmem:[%s1703_s22 + $0x40] sm:$0xff]  ;;  %v328_v18 = vld [vmem:[%s1703_s22 + $0x50] sm:$0xff] }
  0x41   : > { %623 = vmatpush.msra.mxu1 %v449_v50  ;;  %559 = vmatpush.msra.mxu0 %v432_v52  ;;  %v327_v13 = vld [vmem:[%s1703_s22 + $0x48] sm:$0xff]  ;;  %v506_v17 = vld [vmem:[%s2534_s1 + $0x260] sm:$0xff]  ;;  %v537_v20 = vld [vmem:[%s2534_s1 + $0x358] sm:$0xff] }
  0x42   : > { %753 = vmatpush.msra.mxu3 %v481_v51  ;;  %689 = vmatpush.msra.mxu2 %v464_v53  ;;  %v523_v14 = vld [vmem:[%s2534_s1 + $0x2e8] sm:$0xff]  ;;  %v522_v19 = vld [vmem:[%s2534_s1 + $0x2e0] sm:$0xff]  ;;  %v505_v21 = vld [vmem:[%s2534_s1 + $0x258] sm:$0xff] }
  0x43   : > { %624 = vmatpush.msra.mxu1 %v448_v54  ;;  %560 = vmatpush.msra.mxu0 %v431_v56  ;;  %v521_v22 = vld [vmem:[%s2534_s1 + $0x2d8] sm:$0xff]  ;;  %v536_v23 = vld [vmem:[%s2534_s1 + $0x350] sm:$0xff]  ;;  %v334_v27 = vld [vmem:[%s1703_s22 + $0x80] sm:$0xff] }
  0x44   : > { %754 = vmatpush.msra.mxu3 %v480_v55  ;;  %690 = vmatpush.msra.mxu2 %v463_v57  ;;  %v504_v24 = vld [vmem:[%s2534_s1 + $0x250] sm:$0xff]  ;;  %v333_v28 = vld [vmem:[%s1703_s22 + $0x78] sm:$0xff]  ;;  %v335_v29 = vld [vmem:[%s1703_s22 + $0x88] sm:$0xff] }
  0x45   : > { %625 = vmatpush.msra.mxu1 %v447_v58  ;;  %561 = vmatpush.msra.mxu0 %v430_v60  ;;  %v520_v25 = vld [vmem:[%s2534_s1 + $0x2d0] sm:$0xff]  ;;  %v535_v30 = vld [vmem:[%s2534_s1 + $0x348] sm:$0xff]  ;;  %v341_v34 = vld [vmem:[%s1703_s22 + $0xb8] sm:$0xff] }
  0x46   : > { %755 = vmatpush.msra.mxu3 %v479_v59  ;;  %691 = vmatpush.msra.mxu2 %v462_v61  ;;  %v332_v26 = vld [vmem:[%s1703_s22 + $0x70] sm:$0xff]  ;;  %v503_v31 = vld [vmem:[%s2534_s1 + $0x248] sm:$0xff]  ;;  %v342_v36 = vld [vmem:[%s1703_s22 + $0xc0] sm:$0xff] }
  0x47   : > { %562 = vmatmul.f32.vlgmr.msra.gmra.mxu0 %v318_v62  ;;  %692 = vmatmul.f32.vlgmr.msra.gmra.mxu2 %v320_v63  ;;  %v519_v32 = vld [vmem:[%s2534_s1 + $0x2c8] sm:$0xff]  ;;  %v340_v35 = vld [vmem:[%s1703_s22 + $0xb0] sm:$0xff]  ;;  %v534_v37 = vld [vmem:[%s2534_s1 + $0x340] sm:$0xff] }
  0x48   : > { %936 = vmatpush.msrb.mxu2 %v541_v0  ;;  %626 = vmatpush.msra.mxu1 %v446_v1  ;;  %v339_v33 = vld [vmem:[%s1703_s22 + $0xa8] sm:$0xff]  ;;  %v502_v38 = vld [vmem:[%s2534_s1 + $0x240] sm:$0xff]  ;;  %v348_v41 = vld [vmem:[%s1703_s22 + $0xf0] sm:$0xff] }
  0x49   : > { %756 = vmatpush.msra.mxu3 %v478_v2  ;;  %627 = vmatmul.f32.vlgmr.msra.gmra.mxu1 %v319_v3  ;;  %v518_v39 = vld [vmem:[%s2534_s1 + $0x2c0] sm:$0xff]  ;;  %v347_v42 = vld [vmem:[%s1703_s22 + $0xe8] sm:$0xff]  ;;  %v349_v43 = vld [vmem:[%s1703_s22 + $0xf8] sm:$0xff] }
  0x4a   : > { %757 = vmatmul.f32.vlgmr.msra.gmra.mxu3 %v321_v4  ;;  %806 = vmatpush.msrb.mxu0 %v509_v5  ;;  %v346_v40 = vld [vmem:[%s1703_s22 + $0xe0] sm:$0xff]  ;;  %v533_v44 = vld [vmem:[%s2534_s1 + $0x338] sm:$0xff]  ;;  %v355_v48 = vld [vmem:[%s1703_s22 + $0x128] sm:$0xff] }
  0x4b   : > { %871 = vmatpush.msrb.mxu1 %v525_v6  ;;  %937 = vmatpush.msrb.mxu2 %v540_v7  ;;  %v501_v45 = vld [vmem:[%s2534_s1 + $0x238] sm:$0xff]  ;;  %v354_v49 = vld [vmem:[%s1703_s22 + $0x120] sm:$0xff]  ;;  %v356_v50 = vld [vmem:[%s1703_s22 + $0x130] sm:$0xff] }
  0x4c   : > { %807 = vmatpush.msrb.mxu0 %v508_v8  ;;  %v517_v46 = vld [vmem:[%s2534_s1 + $0x2b8] sm:$0xff]  ;;  %v532_v51 = vld [vmem:[%s2534_s1 + $0x330] sm:$0xff]  ;;  %v362_v55 = vld [vmem:[%s1703_s22 + $0x160] sm:$0xff] }
  0x4d   : > { %872 = vmatpush.msrb.mxu1 %v524_v9  ;;  %938 = vmatpush.msrb.mxu2 %v539_v10  ;;  %v353_v47 = vld [vmem:[%s1703_s22 + $0x118] sm:$0xff]  ;;  %v500_v52 = vld [vmem:[%s2534_s1 + $0x230] sm:$0xff]  ;;  %v363_v57 = vld [vmem:[%s1703_s22 + $0x168] sm:$0xff] }
  0x4e   : > { %808 = vmatpush.msrb.mxu0 %v507_v11  ;;  %v516_v53 = vld [vmem:[%s2534_s1 + $0x2b0] sm:$0xff]  ;;  %v361_v56 = vld [vmem:[%s1703_s22 + $0x158] sm:$0xff]  ;;  %v531_v58 = vld [vmem:[%s2534_s1 + $0x328] sm:$0xff] }
  0x4f   : > { %565 = vmatmul.f32.gmra.mxu0 %v325_v12  ;;  %695 = vmatmul.f32.gmra.mxu2 %v327_v13  ;;  %v360_v54 = vld [vmem:[%s1703_s22 + $0x150] sm:$0xff]  ;;  %v499_v59 = vld [vmem:[%s2534_s1 + $0x228] sm:$0xff]  ;;  %v369_v62 = vld [vmem:[%s1703_s22 + $0x198] sm:$0xff] }
  0x50   : > { %873 = vmatpush.msrb.mxu1 %v523_v14  ;;  %939 = vmatpush.msrb.mxu2 %v538_v15  ;;  %v515_v60 = vld [vmem:[%s2534_s1 + $0x2a8] sm:$0xff]  ;;  %v368_v63 = vld [vmem:[%s1703_s22 + $0x190] sm:$0xff]  ;;  %v370_v0 = vld [vmem:[%s1703_s22 + $0x1a0] sm:$0xff] }
  0x51   : > { %630 = vmatmul.f32.gmra.mxu1 %v326_v16  ;;  %809 = vmatpush.msrb.mxu0 %v506_v17  ;;  %v367_v61 = vld [vmem:[%s1703_s22 + $0x188] sm:$0xff]  ;;  %v530_v1 = vld [vmem:[%s2534_s1 + $0x320] sm:$0xff]  ;;  %v376_v5 = vld [vmem:[%s1703_s22 + $0x1d0] sm:$0xff] }
  0x52   : > { %760 = vmatmul.f32.gmra.mxu3 %v328_v18  ;;  %874 = vmatpush.msrb.mxu1 %v522_v19  ;;  %v498_v2 = vld [vmem:[%s2534_s1 + $0x220] sm:$0xff]  ;;  %v375_v6 = vld [vmem:[%s1703_s22 + $0x1c8] sm:$0xff]  ;;  %v377_v7 = vld [vmem:[%s1703_s22 + $0x1d8] sm:$0xff] }
  0x53   : > { %940 = vmatpush.msrb.mxu2 %v537_v20  ;;  %810 = vmatpush.msrb.mxu0 %v505_v21  ;;  %v514_v3 = vld [vmem:[%s2534_s1 + $0x2a0] sm:$0xff]  ;;  %v529_v8 = vld [vmem:[%s2534_s1 + $0x318] sm:$0xff]  ;;  %v383_v12 = vld [vmem:[%s1703_s22 + $0x208] sm:$0xff] }
  0x54   : > { %875 = vmatpush.msrb.mxu1 %v521_v22  ;;  %v374_v4 = vld [vmem:[%s1703_s22 + $0x1c0] sm:$0xff]  ;;  %v497_v9 = vld [vmem:[%s2534_s1 + $0x218] sm:$0xff]  ;;  %v384_v14 = vld [vmem:[%s1703_s22 + $0x210] sm:$0xff] }
  0x55   : > { %941 = vmatpush.msrb.mxu2 %v536_v23  ;;  %811 = vmatpush.msrb.mxu0 %v504_v24  ;;  %v513_v10 = vld [vmem:[%s2534_s1 + $0x298] sm:$0xff]  ;;  %v382_v13 = vld [vmem:[%s1703_s22 + $0x200] sm:$0xff]  ;;  %v528_v15 = vld [vmem:[%s2534_s1 + $0x310] sm:$0xff] }
  0x56   : > { %876 = vmatpush.msrb.mxu1 %v520_v25  ;;  %v381_v11 = vld [vmem:[%s1703_s22 + $0x1f8] sm:$0xff]  ;;  %v496_v16 = vld [vmem:[%s2534_s1 + $0x210] sm:$0xff]  ;;  %v390_v19 = vld [vmem:[%s1703_s22 + $0x240] sm:$0xff] }
  0x57   : > { %568 = vmatmul.f32.gmra.mxu0 %v332_v26  ;;  %698 = vmatmul.f32.gmra.mxu2 %v334_v27  ;;  %v512_v17 = vld [vmem:[%s2534_s1 + $0x290] sm:$0xff]  ;;  %v389_v20 = vld [vmem:[%s1703_s22 + $0x238] sm:$0xff]  ;;  %v391_v21 = vld [vmem:[%s1703_s22 + $0x248] sm:$0xff] }
  0x58   : > { %942 = vmatpush.msrb.mxu2 %v535_v30  ;;  %812 = vmatpush.msrb.mxu0 %v503_v31  ;;  %v388_v18 = vld [vmem:[%s1703_s22 + $0x230] sm:$0xff]  ;;  %v527_v22 = vld [vmem:[%s2534_s1 + $0x308] sm:$0xff]  ;;  %v397_v26 = vld [vmem:[%s1703_s22 + $0x278] sm:$0xff] }
  0x59   : > { %633 = vmatmul.f32.gmra.mxu1 %v333_v28  ;;  %v495_v23 = vld [vmem:[%s2534_s1 + $0x208] sm:$0xff]  ;;  %v396_v27 = vld [vmem:[%s1703_s22 + $0x270] sm:$0xff]  ;;  %v398_v28 = vld [vmem:[%s1703_s22 + $0x280] sm:$0xff] }
  0x5a   : > { %763 = vmatmul.f32.gmra.mxu3 %v335_v29  ;;  %877 = vmatpush.msrb.mxu1 %v519_v32  ;;  %v511_v24 = vld [vmem:[%s2534_s1 + $0x288] sm:$0xff]  ;;  %v526_v29 = vld [vmem:[%s2534_s1 + $0x300] sm:$0xff] }
  0x5b   : > { %943 = vmatpush.msrb.mxu2 %v534_v37  ;;  %813 = vmatpush.msrb.mxu0 %v502_v38  ;;  %v395_v25 = vld [vmem:[%s1703_s22 + $0x268] sm:$0xff]  ;;  %v494_v30 = vld [vmem:[%s2534_s1 + $0x200] sm:$0xff] }
  0x5c   : > { %878 = vmatpush.msrb.mxu1 %v518_v39  ;;  %v510_v31 = vld [vmem:[%s2534_s1 + $0x280] sm:$0xff]  ;;  %v411_v37 = vld [vmem:[%s1703_s22 + $0x2e8] sm:$0xff]  ;;  %v412_v39 = vld [vmem:[%s1703_s22 + $0x2f0] sm:$0xff] }
  0x5d   : > { %944 = vmatpush.msrb.mxu2 %v533_v44  ;;  %814 = vmatpush.msrb.mxu0 %v501_v45  ;;  %v402_v32 = vld [vmem:[%s1703_s22 + $0x2a0] sm:$0xff]  ;;  %v419_v44 = vld [vmem:[%s1703_s22 + $0x328] sm:$0xff] }
  0x5e   : > { %879 = vmatpush.msrb.mxu1 %v517_v46  ;;  %v410_v38 = vld [vmem:[%s1703_s22 + $0x2e0] sm:$0xff]  ;;  %v423_v45 = vld [vmem:[%s1703_s22 + $0x348] sm:$0xff]  ;;  %v425_v46 = vld [vmem:[%s1703_s22 + $0x358] sm:$0xff] }
  0x5f   : > { %571 = vmatmul.f32.gmra.mxu0 %v339_v33  ;;  %701 = vmatmul.f32.gmra.mxu2 %v341_v34  ;;  %v404_v33 = vld [vmem:[%s1703_s22 + $0x2b0] sm:$0xff]  ;;  %v403_v34 = vld [vmem:[%s1703_s22 + $0x2a8] sm:$0xff] }
  0x60   : > { %945 = vmatpush.msrb.mxu2 %v532_v51  ;;  %815 = vmatpush.msrb.mxu0 %v500_v52  ;;  %v324_v51 = vld [vmem:[%s1703_s22 + $0x30] sm:$0xff] }
  0x61   : > { %636 = vmatmul.f32.gmra.mxu1 %v340_v35  ;;  %v405_v35 = vld [vmem:[%s1703_s22 + $0x2b8] sm:$0xff] }
  0x62   : > { %766 = vmatmul.f32.gmra.mxu3 %v342_v36  ;;  %880 = vmatpush.msrb.mxu1 %v516_v53  ;;  %v409_v36 = vld [vmem:[%s1703_s22 + $0x2d8] sm:$0xff]  ;;  %v323_v53 = vld [vmem:[%s1703_s22 + $0x28] sm:$0xff] }
  0x63   : > { %946 = vmatpush.msrb.mxu2 %v531_v58  ;;  %816 = vmatpush.msrb.mxu0 %v499_v59  ;;  %v330_v59 = vld [vmem:[%s1703_s22 + $0x60] sm:$0xff] }
  0x64   : > { %881 = vmatpush.msrb.mxu1 %v515_v60 }
  0x65   : > { %947 = vmatpush.msrb.mxu2 %v530_v1  ;;  %817 = vmatpush.msrb.mxu0 %v498_v2  ;;  %v337_v1 = vld [vmem:[%s1703_s22 + $0x98] sm:$0xff] }
  0x66   : > { %882 = vmatpush.msrb.mxu1 %v514_v3  ;;  %v1018_v3 = vld [vmem:[%s2536_s3 + $0x8] sm:$0xff] }
  0x67   : > { %574 = vmatmul.f32.gmra.mxu0 %v346_v40  ;;  %704 = vmatmul.f32.gmra.mxu2 %v348_v41  ;;  %v1019_v40 = vld [vmem:[%s2536_s3 + $0x10] sm:$0xff] }
  0x68   : > { %948 = vmatpush.msrb.mxu2 %v529_v8  ;;  %818 = vmatpush.msrb.mxu0 %v497_v9  ;;  %v416_v41 = vld [vmem:[%s1703_s22 + $0x310] sm:$0xff] }
  0x69   : > { %639 = vmatmul.f32.gmra.mxu1 %v347_v42  ;;  %1086 = vmatpush.msrb.mxu3 %v1019_v40  ;;  %v418_v42 = vld [vmem:[%s1703_s22 + $0x320] sm:$0xff]  ;;  %v344_v8 = vld [vmem:[%s1703_s22 + $0xd0] sm:$0xff]  ;;  %v379_v40 = vld [vmem:[%s1703_s22 + $0x1e8] sm:$0xff] }
  0x6a   : > { %769 = vmatmul.f32.gmra.mxu3 %v349_v43  ;;  %883 = vmatpush.msrb.mxu1 %v513_v10  ;;  %v417_v43 = vld [vmem:[%s1703_s22 + $0x318] sm:$0xff] }
  0x6b   : > { %949 = vmatpush.msrb.mxu2 %v528_v15  ;;  %819 = vmatpush.msrb.mxu0 %v496_v16 }
  0x6c   : > { %884 = vmatpush.msrb.mxu1 %v512_v17  ;;  %1087 = vmatpush.msrb.mxu3 %v1018_v3  ;;  %v357_v17 = vld [vmem:[%s1703_s22 + $0x138] sm:$0xff] }
  0x6d   : > { %950 = vmatpush.msrb.mxu2 %v527_v22  ;;  %820 = vmatpush.msrb.mxu0 %v495_v23  ;;  %v364_v23 = vld [vmem:[%s1703_s22 + $0x170] sm:$0xff] }
  0x6e   : > { %885 = vmatpush.msrb.mxu1 %v511_v24  ;;  %v366_v24 = vld [vmem:[%s1703_s22 + $0x180] sm:$0xff] }
  0x6f   : > { %577 = vmatmul.f32.gmra.mxu0 %v353_v47  ;;  %707 = vmatmul.f32.gmra.mxu2 %v355_v48  ;;  %v424_v47 = vld [vmem:[%s1703_s22 + $0x350] sm:$0xff]  ;;  %v426_v48 = vld [vmem:[%s1703_s22 + $0x360] sm:$0xff] }
  0x70   : > { %951 = vmatpush.msrb.mxu2 %v526_v29  ;;  %821 = vmatpush.msrb.mxu0 %v494_v30  ;;  %v371_v29 = vld [vmem:[%s1703_s22 + $0x1a8] sm:$0xff]  ;;  %v373_v30 = vld [vmem:[%s1703_s22 + $0x1b8] sm:$0xff] }
  0x71   : > { %642 = vmatmul.f32.gmra.mxu1 %v354_v49 }
  0x72   : > { %772 = vmatmul.f32.gmra.mxu3 %v356_v50  ;;  %886 = vmatpush.msrb.mxu1 %v510_v31  ;;  %v322_v50 = vld [vmem:[%s1703_s22 + $0x20] sm:$0xff] }
  0x77   : > { %580 = vmatmul.f32.gmra.mxu0 %v360_v54  ;;  %710 = vmatmul.f32.gmra.mxu2 %v362_v55 }
  0x79   : > { %645 = vmatmul.f32.gmra.mxu1 %v361_v56  ;;  %v329_v56 = vld [vmem:[%s1703_s22 + $0x58] sm:$0xff] }
  0x7a   : > { %775 = vmatmul.f32.gmra.mxu3 %v363_v57  ;;  %v331_v57 = vld [vmem:[%s1703_s22 + $0x68] sm:$0xff] }
  0x7f   : > { %583 = vmatmul.f32.gmra.mxu0 %v367_v61  ;;  %713 = vmatmul.f32.gmra.mxu2 %v369_v62  ;;  %v336_v62 = vld [vmem:[%s1703_s22 + $0x90] sm:$0xff] }
  0x81   : > { %648 = vmatmul.f32.gmra.mxu1 %v368_v63  ;;  %v338_v63 = vld [vmem:[%s1703_s22 + $0xa0] sm:$0xff] }
  0x82   : > { %778 = vmatmul.f32.gmra.mxu3 %v370_v0 }
  0x87   : > { %586 = vmatmul.f32.gmra.mxu0 %v374_v4  ;;  %716 = vmatmul.f32.gmra.mxu2 %v376_v5  ;;  %v343_v5 = vld [vmem:[%s1703_s22 + $0xc8] sm:$0xff] }
  0x89   : > { %651 = vmatmul.f32.gmra.mxu1 %v375_v6  ;;  %v345_v6 = vld [vmem:[%s1703_s22 + $0xd8] sm:$0xff] }
  0x8a   : > { %781 = vmatmul.f32.gmra.mxu3 %v377_v7 }
  0x8f   : > { %589 = vmatmul.f32.gmra.mxu0 %v381_v11  ;;  %719 = vmatmul.f32.gmra.mxu2 %v383_v12  ;;  %v350_v11 = vld [vmem:[%s1703_s22 + $0x100] sm:$0xff]  ;;  %v352_v12 = vld [vmem:[%s1703_s22 + $0x110] sm:$0xff] }
  0x91   : > { %654 = vmatmul.f32.gmra.mxu1 %v382_v13 }
  0x92   : > { %784 = vmatmul.f32.gmra.mxu3 %v384_v14  ;;  %v351_v14 = vld [vmem:[%s1703_s22 + $0x108] sm:$0xff] }
  0x97   : > { %592 = vmatmul.f32.gmra.mxu0 %v388_v18  ;;  %722 = vmatmul.f32.gmra.mxu2 %v390_v19  ;;  %v359_v18 = vld [vmem:[%s1703_s22 + $0x148] sm:$0xff] }
  0x99   : > { %657 = vmatmul.f32.gmra.mxu1 %v389_v20  ;;  %v358_v20 = vld [vmem:[%s1703_s22 + $0x140] sm:$0xff] }
  0x9a   : > { %787 = vmatmul.f32.gmra.mxu3 %v391_v21 }
  0x9f   : > { %595 = vmatmul.f32.gmra.mxu0 %v395_v25  ;;  %725 = vmatmul.f32.gmra.mxu2 %v397_v26  ;;  %v365_v26 = vld [vmem:[%s1703_s22 + $0x178] sm:$0xff] }
  0xa1   : > { %660 = vmatmul.f32.gmra.mxu1 %v396_v27 }
  0xa2   : > { %790 = vmatmul.f32.gmra.mxu3 %v398_v28 }
  0xa7   : > { %598 = vmatmul.f32.gmra.mxu0 %v402_v32  ;;  %728 = vmatmul.f32.gmra.mxu2 %v404_v33  ;;  %v372_v32 = vld [vmem:[%s1703_s22 + $0x1b0] sm:$0xff] }
  0xa9   : > { %663 = vmatmul.f32.gmra.mxu1 %v403_v34  ;;  %v2190_v34 = vld [vmem:[%s2535_s2] ss:$0 sm:$0xff] }
  0xaa   : > { %793 = vmatmul.f32.gmra.mxu3 %v405_v35 }
  0xaf   : > { %601 = vmatmul.f32.gmra.mxu0 %v409_v36  ;;  %731 = vmatmul.f32.gmra.mxu2 %v411_v37  ;;  %v378_v36 = vld [vmem:[%s1703_s22 + $0x1e0] sm:$0xff]  ;;  %v380_v37 = vld [vmem:[%s1703_s22 + $0x1f0] sm:$0xff] }
  0xb1   : > { %666 = vmatmul.f32.gmra.mxu1 %v410_v38 }
  0xb2   : > { %796 = vmatmul.f32.gmra.mxu3 %v412_v39 }
  0xb7   : > { %604 = vmatmul.f32.gmra.mxu0 %v416_v41  ;;  %734 = vmatmul.f32.gmra.mxu2 %v418_v42  ;;  %v1017_v41 = vld [vmem:[%s2536_s3] sm:$0xff] }
  0xb8   : > { %1088 = vmatpush.msrb.mxu3 %v1017_v41 }
  0xb9   : > { %669 = vmatmul.f32.gmra.mxu1 %v417_v43 }
  0xba   : > { %799 = vmatmul.f32.gmra.mxu3 %v419_v44 }
  0xbf   : > { %607 = vmatmul.f32.gmra.mxu0 %v423_v45  ;;  %737 = vmatmul.f32.gmra.mxu2 %v425_v46  ;;  %v385_v46 = vld [vmem:[%s1703_s22 + $0x218] sm:$0xff] }
  0xc1   : > { %672 = vmatmul.f32.gmra.mxu1 %v424_v47  ;;  %v387_v47 = vld [vmem:[%s1703_s22 + $0x228] sm:$0xff] }
  0xc2   : > { %802 = vmatmul.f32.gmra.mxu3 %v426_v48 }
  0xc4   : > { %v2112_v49 = vpop.f32.mrf.mxu0 }
  0xc6   : > { %v2116_v52 = vpop.f32.mrf.mxu1 }
  0xc7   : > { %822 = vmatmul.f32.vlgmr.msrb.gmra.mxu0 %v322_v50  ;;  %952 = vmatmul.f32.vlgmr.msrb.gmra.mxu2 %v324_v51  ;;  %v386_v51 = vld [vmem:[%s1703_s22 + $0x220] sm:$0xff] }
  0xc9   : > { %887 = vmatmul.f32.vlgmr.msrb.gmra.mxu1 %v323_v53 }
  0xca   : > { %v2119_v54 = vpop.f32.mrf.mxu2 }
  0xcc   : > { %v2121_v55 = vpop.f32.mrf.mxu0 }
  0xce   : > { %v2125_v58 = vpop.f32.mrf.mxu1 }
  0xcf   : > { %825 = vmatmul.f32.gmra.mxu0 %v329_v56  ;;  %955 = vmatmul.f32.gmra.mxu2 %v331_v57 }
  0xd1   : > { %890 = vmatmul.f32.gmra.mxu1 %v330_v59 }
  0xd2   : > { %v2128_v60 = vpop.f32.mrf.mxu2 }
  0xd4   : > { %v2130_v61 = vpop.f32.mrf.mxu0 }
  0xd6   : > { %v2134_v0 = vpop.f32.mrf.mxu1 }
  0xd7   : > { %828 = vmatmul.f32.gmra.mxu0 %v336_v62  ;;  %958 = vmatmul.f32.gmra.mxu2 %v338_v63  ;;  %v392_v62 = vld [vmem:[%s1703_s22 + $0x250] sm:$0xff]  ;;  %v394_v63 = vld [vmem:[%s1703_s22 + $0x260] sm:$0xff] }
  0xd9   : > { %893 = vmatmul.f32.gmra.mxu1 %v337_v1 }
  0xda   : > { %v2137_v2 = vpop.f32.mrf.mxu2 }
  0xdc   : > { %v2142_v4 = vpop.f32.mrf.mxu0 }
  0xde   : > { %v2146_v7 = vpop.f32.mrf.mxu1 }
  0xdf   : > { %831 = vmatmul.f32.gmra.mxu0 %v343_v5  ;;  %961 = vmatmul.f32.gmra.mxu2 %v345_v6  ;;  %v393_v5 = vld [vmem:[%s1703_s22 + $0x258] sm:$0xff] }
  0xe1   : > { %896 = vmatmul.f32.gmra.mxu1 %v344_v8 }
  0xe2   : > { %v2149_v9 = vpop.f32.mrf.mxu2 }
  0xe4   : > { %v2151_v10 = vpop.f32.mrf.mxu0 }
  0xe6   : > { %v2155_v13 = vpop.f32.mrf.mxu1 }
  0xe7   : > { %834 = vmatmul.f32.gmra.mxu0 %v350_v11  ;;  %964 = vmatmul.f32.gmra.mxu2 %v352_v12 }
  0xe9   : > { %899 = vmatmul.f32.gmra.mxu1 %v351_v14  ;;  %v399_v14 = vld [vmem:[%s1703_s22 + $0x288] sm:$0xff] }
  0xea   : > { %v2158_v15 = vpop.f32.mrf.mxu2 }
  0xec   : > { %v2160_v16 = vpop.f32.mrf.mxu0 }
  0xee   : > { %v2164_v19 = vpop.f32.mrf.mxu1 }
  0xef   : > { %837 = vmatmul.f32.gmra.mxu0 %v357_v17  ;;  %967 = vmatmul.f32.gmra.mxu2 %v359_v18  ;;  %v401_v17 = vld [vmem:[%s1703_s22 + $0x298] sm:$0xff] }
  0xf1   : > { %902 = vmatmul.f32.gmra.mxu1 %v358_v20 }
  0xf2   : > { %v2167_v21 = vpop.f32.mrf.mxu2 }
  0xf4   : > { %v2169_v22 = vpop.f32.mrf.mxu0 }
  0xf6   : > { %v2173_v25 = vpop.f32.mrf.mxu1 }
  0xf7   : > { %840 = vmatmul.f32.gmra.mxu0 %v364_v23  ;;  %970 = vmatmul.f32.gmra.mxu2 %v366_v24  ;;  %v400_v23 = vld [vmem:[%s1703_s22 + $0x290] sm:$0xff] }
  0xf9   : > { %905 = vmatmul.f32.gmra.mxu1 %v365_v26  ;;  %v758_v26 = vpop.f32.mrf.mxu3 }
  0xfa   : > { %v2176_v27 = vpop.f32.mrf.mxu2 }
  0xfc   : > { %v2178_v28 = vpop.f32.mrf.mxu0 }
  0xfe   : > { %v2182_v31 = vpop.f32.mrf.mxu1 }
  0xff   : > { %843 = vmatmul.f32.gmra.mxu0 %v371_v29  ;;  %973 = vmatmul.f32.gmra.mxu2 %v373_v30 }
 0x101   : > { %908 = vmatmul.f32.gmra.mxu1 %v372_v32 }
 0x102   : > { %v2185_v33 = vpop.f32.mrf.mxu2 }
 0x104   : > { %v587_v35 = vpop.f32.mrf.mxu0 }
 0x105   : > { %v588_v38 = vadd.f32 %v2190_v34, %v587_v35  ;;  %v406_v35 = vld [vmem:[%s1703_s22 + $0x2c0] sm:$0xff] }
 0x106   : > { %v652_v39 = vpop.f32.mrf.mxu1 }
 0x107   : > { %v653_v42 = vadd.f32 %v652_v39, %v588_v38  ;;  %846 = vmatmul.f32.gmra.mxu0 %v378_v36  ;;  %976 = vmatmul.f32.gmra.mxu2 %v380_v37  ;;  %v408_v36 = vld [vmem:[%s1703_s22 + $0x2d0] sm:$0xff]  ;;  %v407_v39 = vld [vmem:[%s1703_s22 + $0x2c8] sm:$0xff] }
 0x109   : > { %911 = vmatmul.f32.gmra.mxu1 %v379_v40 }
 0x10a   : > { %v717_v43 = vpop.f32.mrf.mxu2 }
 0x10b   : > { %v2199_v44 = vadd.f32 %v717_v43, %v653_v42  ;;  %v761_v43 = vpop.f32.mrf.mxu3 }
 0x10c   : > { %v590_v45 = vpop.f32.mrf.mxu0 }
 0x10d   : > { %v591_v48 = vadd.f32 %v2190_v34, %v590_v45 }
 0x10e   : > { %v655_v50 = vpop.f32.mrf.mxu1 }
 0x10f   : > { %v656_v53 = vadd.f32 %v655_v50, %v591_v48  ;;  %849 = vmatmul.f32.gmra.mxu0 %v385_v46  ;;  %979 = vmatmul.f32.gmra.mxu2 %v387_v47  ;;  %v413_v46 = vld [vmem:[%s1703_s22 + $0x2f8] sm:$0xff]  ;;  %v415_v47 = vld [vmem:[%s1703_s22 + $0x308] sm:$0xff] }
 0x111   : > { %914 = vmatmul.f32.gmra.mxu1 %v386_v51  ;;  %v414_v51 = vld [vmem:[%s1703_s22 + $0x300] sm:$0xff] }
 0x112   : > { %v720_v56 = vpop.f32.mrf.mxu2 }
 0x113   : > { %v2205_v57 = vadd.f32 %v720_v56, %v656_v53 }
 0x114   : > { %v593_v59 = vpop.f32.mrf.mxu0 }
 0x115   : > { %v594_v1 = vadd.f32 %v2190_v34, %v593_v59 }
 0x116   : > { %v658_v3 = vpop.f32.mrf.mxu1 }
 0x117   : > { %v659_v6 = vadd.f32 %v658_v3, %v594_v1  ;;  %852 = vmatmul.f32.gmra.mxu0 %v392_v62  ;;  %982 = vmatmul.f32.gmra.mxu2 %v394_v63  ;;  %v420_v63 = vld [vmem:[%s1703_s22 + $0x330] sm:$0xff]  ;;  %v422_v1 = vld [vmem:[%s1703_s22 + $0x340] sm:$0xff] }
 0x119   : > { %917 = vmatmul.f32.gmra.mxu1 %v393_v5  ;;  %v764_v5 = vpop.f32.mrf.mxu3 }
 0x11a   : > { %v723_v8 = vpop.f32.mrf.mxu2 }
 0x11b   : > { %v2211_v11 = vadd.f32 %v723_v8, %v659_v6  ;;  %v421_v8 = vld [vmem:[%s1703_s22 + $0x338] sm:$0xff] }
 0x11c   : > { %v596_v12 = vpop.f32.mrf.mxu0 }
 0x11d   : > { %v597_v18 = vadd.f32 %v2190_v34, %v596_v12  ;;  %v564_v12 = vadd.f32 %v2190_v34, %v2112_v49  ;;  %v567_v49 = vadd.f32 %v2190_v34, %v2121_v55 }
 0x11e   : > { %v661_v20 = vpop.f32.mrf.mxu1 }
 0x11f   : > { %v662_v24 = vadd.f32 %v661_v20, %v597_v18  ;;  %855 = vmatmul.f32.gmra.mxu0 %v399_v14  ;;  %985 = vmatmul.f32.gmra.mxu2 %v401_v17  ;;  %v629_v18 = vadd.f32 %v2116_v52, %v564_v12 }
 0x121   : > { %920 = vmatmul.f32.gmra.mxu1 %v400_v23 }
 0x122   : > { %v726_v29 = vpop.f32.mrf.mxu2 }
 0x123   : > { %v2217_v30 = vadd.f32 %v726_v29, %v662_v24  ;;  %v427_v24 = vld [vmem:[%s1703_s22 + $0x368] sm:$0xff]  ;;  %v429_v29 = vld [vmem:[%s1703_s22 + $0x378] sm:$0xff] }
 0x124   : > { %v599_v32 = vpop.f32.mrf.mxu0 }
 0x125   : > { %v600_v37 = vadd.f32 %v2190_v34, %v599_v32 }
 0x126   : > { %v664_v38 = vpop.f32.mrf.mxu1 }
 0x127   : > { %v665_v40 = vadd.f32 %v664_v38, %v600_v37  ;;  %858 = vmatmul.f32.gmra.mxu0 %v406_v35  ;;  %988 = vmatmul.f32.gmra.mxu2 %v408_v36  ;;  %v428_v36 = vld [vmem:[%s1703_s22 + $0x370] sm:$0xff]  ;;  %v694_v37 = vadd.f32 %v2119_v54, %v629_v18  ;;  %v570_v54 = vadd.f32 %v2190_v34, %v2130_v61  ;;  %s1429_s22 = sshll.u32 %s1421_s28, 4  ;;  %s1599_s28 = smov 112  }
 0x128   : > { %p307_p6 = scmp.lt.s32.totalorder %s1429_s22, 31 }
 0x129   : > { %923 = vmatmul.f32.gmra.mxu1 %v407_v39  ;;  %v767_v39 = vpop.f32.mrf.mxu3 }
 0x12a   : > { %v729_v41 = vpop.f32.mrf.mxu2  ;;  %s2548_s22 = smov (!%p307_p6, %s1429_s22), 31 }
 0x12b   : > { %v2223_v42 = vadd.f32 %v729_v41, %v665_v40  ;;  %v759_v40 = vadd.f32 %v758_v26, %v694_v37  ;;  %v632_v41 = vadd.f32 %v2125_v58, %v567_v49  ;;  %s1430_s10 = sshll.u32 %s2548_s22, 3 }
 0x12c   : > { %v602_v45 = vpop.f32.mrf.mxu0  ;;  %s2314_s27 = scalar_lea.vmem %s2539_s6, %s1430_s10  ;;  %s2454_s24 = scalar_lea.vmem %s2540_s7, %s1430_s10 }
 0x12d   : > { %v603_v48 = vadd.f32 %v2190_v34, %v602_v45 }
 0x12e   : > { %v667_v50 = vpop.f32.mrf.mxu1 }
 0x12f   : > { %v668_v53 = vadd.f32 %v667_v50, %v603_v48  ;;  %861 = vmatmul.f32.gmra.mxu0 %v413_v46  ;;  %991 = vmatmul.f32.gmra.mxu2 %v415_v47  ;;  %v697_v50 = vadd.f32 %v2128_v60, %v632_v41  ;;  %v573_v60 = vadd.f32 %v2190_v34, %v2142_v4 }
 0x131   : > { %926 = vmatmul.f32.gmra.mxu1 %v414_v51  ;;  %v770_v51 = vpop.f32.mrf.mxu3 }
 0x132   : > { %v732_v56 = vpop.f32.mrf.mxu2 }
 0x133   : > { %v2229_v59 = vadd.f32 %v732_v56, %v668_v53  ;;  %v762_v56 = vadd.f32 %v761_v43, %v697_v50  ;;  %v638_v43 = vadd.f32 %v2146_v7, %v573_v60 }
 0x134   : > { %v605_v62 = vpop.f32.mrf.mxu0 }
 0x135   : > { %v606_v3 = vadd.f32 %v2190_v34, %v605_v62  ;;  %v635_v62 = vadd.f32 %v2134_v0, %v570_v54 }
 0x136   : > { %v670_v6 = vpop.f32.mrf.mxu1 }
 0x137   : > { %v671_v14 = vadd.f32 %v670_v6, %v606_v3  ;;  %864 = vmatmul.f32.gmra.mxu0 %v420_v63  ;;  %994 = vmatmul.f32.gmra.mxu2 %v422_v1  ;;  %v700_v6 = vadd.f32 %v2137_v2, %v635_v62  ;;  %v576_v2 = vadd.f32 %v2190_v34, %v2151_v10 }
 0x139   : > { %929 = vmatmul.f32.gmra.mxu1 %v421_v8  ;;  %v765_v12 = vadd.f32 %v764_v5, %v700_v6  ;;  %v773_v0 = vpop.f32.mrf.mxu3  ;;  %v641_v5 = vadd.f32 %v2155_v13, %v576_v2 }
 0x13a   : > { %v735_v17 = vpop.f32.mrf.mxu2 }
 0x13b   : > { %v2238_v20 = vadd.f32 %v735_v17, %v671_v14 }
 0x13c   : > { %v608_v23 = vpop.f32.mrf.mxu0 }
 0x13d   : > { %v609_v32 = vadd.f32 %v2190_v34, %v608_v23 }
 0x13e   : > { %v673_v35 = vpop.f32.mrf.mxu1 }
 0x13f   : > { %v674_v38 = vadd.f32 %v673_v35, %v609_v32  ;;  %867 = vmatmul.f32.gmra.mxu0 %v427_v24  ;;  %997 = vmatmul.f32.gmra.mxu2 %v429_v29  ;;  %v703_v29 = vadd.f32 %v2149_v9, %v638_v43  ;;  %v579_v9 = vadd.f32 %v2190_v34, %v2160_v16 }
 0x141   : > { %932 = vmatmul.f32.gmra.mxu1 %v428_v36  ;;  %v768_v35 = vadd.f32 %v767_v39, %v703_v29  ;;  %v644_v39 = vadd.f32 %v2164_v19, %v579_v9 }
 0x142   : > { %v738_v52 = vpop.f32.mrf.mxu2 }
 0x143   : > { %v2248_v45 = vadd.f32 %v738_v52, %v674_v38  ;;  %v776_v38 = vpop.f32.mrf.mxu3 }
 0x144   : > { %v823_v46 = vpop.f32.mrf.mxu0 }
 0x145   : > { %v824_v47 = vadd.f32 %v823_v46, %v759_v40  ;;  %v706_v40 = vadd.f32 %v2158_v15, %v641_v5  ;;  %v582_v15 = vadd.f32 %v2190_v34, %v2169_v22 }
 0x146   : > { %v888_v48 = vpop.f32.mrf.mxu1 }
 0x147   : > { %v889_v55 = vadd.f32 %v888_v48, %v824_v47  ;;  %v771_v46 = vadd.f32 %v770_v51, %v706_v40  ;;  %v647_v51 = vadd.f32 %v2173_v25, %v582_v15 }
 0x14a   : > { %v953_v53 = vpop.f32.mrf.mxu2 }
 0x14b   : > { %v954_v63 = vadd.f32 %v953_v53, %v889_v55  ;;  %v709_v55 = vadd.f32 %v2167_v21, %v644_v39  ;;  %v779_v16 = vpop.f32.mrf.mxu3  ;;  %v585_v21 = vadd.f32 %v2190_v34, %v2178_v28 }
 0x14c   : > { %v826_v26 = vpop.f32.mrf.mxu0 }
 0x14d   : > { %v1001_v58 = vmax.f32 %v954_v63, 0.0  ;;  %v827_v1 = vadd.f32 %v826_v26, %v762_v56  ;;  %v774_v62 = vadd.f32 %v773_v0, %v709_v55 }
 0x14e   : > { %v891_v3 = vpop.f32.mrf.mxu1 }
 0x14f   : > { %1433 = vmatmul.msk.f32.vlgmr.msrb.gmra.mxu3 %vm1024_vm0, %v1001_v58  ;;  %v892_v61 = vadd.f32 %v891_v3, %v827_v1  ;;  %v712_v3 = vadd.f32 %v2176_v27, %v647_v51 }
 0x152   : > { %v956_v8 = vpop.f32.mrf.mxu2 }
 0x153   : > { %v957_v14 = vadd.f32 %v956_v8, %v892_v61  ;;  %v782_v6 = vpop.f32.mrf.mxu3  ;;  %v777_v61 = vadd.f32 %v776_v38, %v712_v3  ;;  %v650_v8 = vadd.f32 %v2182_v31, %v585_v21 }
 0x154   : > { %v829_v17 = vpop.f32.mrf.mxu0 }
 0x155   : > { %v1002_v18 = vmax.f32 %v957_v14, 0.0  ;;  %v830_v23 = vadd.f32 %v829_v17, %v765_v12  ;;  %v715_v17 = vadd.f32 %v2185_v33, %v650_v8 }
 0x156   : > { %v894_v24 = vpop.f32.mrf.mxu1 }
 0x157   : > { %1434 = vmatmul.msk.f32.gmra.mxu3 %vm1024_vm0, %v1002_v18  ;;  %v895_v4 = vadd.f32 %v894_v24, %v830_v23  ;;  %v780_v28 = vadd.f32 %v779_v16, %v715_v17 }
 0x15a   : > { %v959_v32 = vpop.f32.mrf.mxu2 }
 0x15b   : > { %v960_v36 = vadd.f32 %v959_v32, %v895_v4  ;;  %v785_v23 = vpop.f32.mrf.mxu3 }
 0x15c   : > { %v832_v7 = vpop.f32.mrf.mxu0  ;;  %v786_v40 = vadd.f32 %v785_v23, %v2205_v57 }
 0x15d   : > { %v1003_v37 = vmax.f32 %v960_v36, 0.0  ;;  %v833_v49 = vadd.f32 %v832_v7, %v768_v35  ;;  %v783_v35 = vadd.f32 %v782_v6, %v2199_v44 }
 0x15e   : > { %v897_v52 = vpop.f32.mrf.mxu1 }
 0x15f   : > { %1435 = vmatmul.msk.f32.gmra.mxu3 %vm1024_vm0, %v1003_v37  ;;  %v898_v10 = vadd.f32 %v897_v52, %v833_v49 }
 0x162   : > { %v962_v41 = vpop.f32.mrf.mxu2 }
 0x163   : > { %v963_v47 = vadd.f32 %v962_v41, %v898_v10  ;;  %v788_v37 = vpop.f32.mrf.mxu3 }
 0x164   : > { %v835_v13 = vpop.f32.mrf.mxu0 }
 0x165   : > { %v1004_v48 = vmax.f32 %v963_v47, 0.0  ;;  %v836_v50 = vadd.f32 %v835_v13, %v771_v46 }
 0x166   : > { %v900_v54 = vpop.f32.mrf.mxu1 }
 0x167   : > { %1436 = vmatmul.msk.f32.gmra.mxu3 %vm1024_vm0, %v1004_v48  ;;  %v901_v53 = vadd.f32 %v900_v54, %v836_v50  ;;  %v789_v48 = vadd.f32 %v788_v37, %v2211_v11 }
 0x16a   : > { %v965_v56 = vpop.f32.mrf.mxu2 }
 0x16b   : > { %v966_v63 = vadd.f32 %v965_v56, %v901_v53  ;;  %v791_v44 = vpop.f32.mrf.mxu3 }
 0x16c   : > { %v838_v19 = vpop.f32.mrf.mxu0 }
 0x16d   : > { %v1005_v26 = vmax.f32 %v966_v63, 0.0  ;;  %v839_v58 = vadd.f32 %v838_v19, %v774_v62  ;;  %v792_v62 = vadd.f32 %v791_v44, %v2217_v30 }
 0x16e   : > { %v903_v1 = vpop.f32.mrf.mxu1 }
 0x16f   : > { %1437 = vmatmul.msk.f32.gmra.mxu3 %vm1024_vm0, %v1005_v26  ;;  %v904_v22 = vadd.f32 %v903_v1, %v839_v58 }
 0x172   : > { %v968_v60 = vpop.f32.mrf.mxu2 }
 0x173   : > { %v969_v12 = vadd.f32 %v968_v60, %v904_v22  ;;  %v794_v53 = vpop.f32.mrf.mxu3 }
 0x174   : > { %v841_v25 = vpop.f32.mrf.mxu0  ;;  %v795_v3 = vadd.f32 %v794_v53, %v2223_v42 }
 0x175   : > { %v1006_v43 = vmax.f32 %v969_v12, 0.0  ;;  %v842_v14 = vadd.f32 %v841_v25, %v777_v61 }
 0x176   : > { %v906_v0 = vpop.f32.mrf.mxu1 }
 0x177   : > { %1438 = vmatmul.msk.f32.gmra.mxu3 %vm1024_vm0, %v1006_v43  ;;  %v907_v27 = vadd.f32 %v906_v0, %v842_v14 }
 0x17a   : > { %v971_v18 = vpop.f32.mrf.mxu2 }
 0x17b   : > { %v972_v34 = vadd.f32 %v971_v18, %v907_v27  ;;  %v797_v22 = vpop.f32.mrf.mxu3 }
 0x17c   : > { %v844_v24 = vpop.f32.mrf.mxu0  ;;  %v798_v25 = vadd.f32 %v797_v22, %v2229_v59 }
 0x17d   : > { %v1007_v29 = vmax.f32 %v972_v34, 0.0  ;;  %v845_v2 = vadd.f32 %v844_v24, %v780_v28 }
 0x17e   : > { %v909_v4 = vpop.f32.mrf.mxu1 }
 0x17f   : > { %1439 = vmatmul.msk.f32.gmra.mxu3 %vm1024_vm0, %v1007_v29  ;;  %v910_v31 = vadd.f32 %v909_v4, %v845_v2 }
 0x182   : > { %v974_v32 = vpop.f32.mrf.mxu2 }
 0x183   : > { %v975_v5 = vadd.f32 %v974_v32, %v910_v31  ;;  %v800_v27 = vpop.f32.mrf.mxu3 }
 0x184   : > { %v847_v36 = vpop.f32.mrf.mxu0  ;;  %v801_v34 = vadd.f32 %v800_v27, %v2238_v20 }
 0x185   : > { %v1008_v33 = vmax.f32 %v975_v5, 0.0  ;;  %v848_v7 = vadd.f32 %v847_v36, %v783_v35 }
 0x186   : > { %v912_v49 = vpop.f32.mrf.mxu1 }
 0x187   : > { %1440 = vmatmul.msk.f32.gmra.mxu3 %vm1024_vm0, %v1008_v33  ;;  %v913_v38 = vadd.f32 %v912_v49, %v848_v7 }
 0x18a   : > { %v977_v52 = vpop.f32.mrf.mxu2 }
 0x18b   : > { %v978_v9 = vadd.f32 %v977_v52, %v913_v38  ;;  %v803_v59 = vpop.f32.mrf.mxu3 }
 0x18c   : > { %v850_v10 = vpop.f32.mrf.mxu0  ;;  %v804_v35 = vadd.f32 %v803_v59, %v2248_v45  ;;  %v2307_v45 = vld [vmem:[%s2537_s4] ss:$0 sm:$0xff] }
 0x18d   : > { %v1009_v41 = vmax.f32 %v978_v9, 0.0  ;;  %v851_v46 = vadd.f32 %v850_v10, %v786_v40 }
 0x18e   : > { %v915_v39 = vpop.f32.mrf.mxu1 }
 0x18f   : > { %1441 = vmatmul.msk.f32.gmra.mxu3 %vm1024_vm0, %v1009_v41  ;;  %v916_v47 = vadd.f32 %v915_v39, %v851_v46 }
 0x192   : > { %v980_v13 = vpop.f32.mrf.mxu2 }
 0x193   : > { %v981_v50 = vadd.f32 %v980_v13, %v916_v47 }
 0x194   : > { %v853_v54 = vpop.f32.mrf.mxu0 }
 0x195   : > { %v1010_v55 = vmax.f32 %v981_v50, 0.0  ;;  %v854_v15 = vadd.f32 %v853_v54, %v789_v48 }
 0x196   : > { %v918_v16 = vpop.f32.mrf.mxu1 }
 0x197   : > { %1442 = vmatmul.msk.f32.gmra.mxu3 %vm1024_vm0, %v1010_v55  ;;  %v919_v57 = vadd.f32 %v918_v16, %v854_v15 }
 0x19a   : > { %v983_v56 = vpop.f32.mrf.mxu2 }
 0x19b   : > { %v984_v51 = vadd.f32 %v983_v56, %v919_v57 }
 0x19c   : > { %v856_v63 = vpop.f32.mrf.mxu0 }
 0x19d   : > { %v1011_v19 = vmax.f32 %v984_v51, 0.0  ;;  %v857_v26 = vadd.f32 %v856_v63, %v792_v62 }
 0x19e   : > { %v921_v58 = vpop.f32.mrf.mxu1 }
 0x19f   : > { %1443 = vmatmul.msk.f32.gmra.mxu3 %vm1024_vm0, %v1011_v19  ;;  %v922_v11 = vadd.f32 %v921_v58, %v857_v26 }
 0x1a2   : > { %v986_v1 = vpop.f32.mrf.mxu2 }
 0x1a3   : > { %v987_v21 = vadd.f32 %v986_v1, %v922_v11 }
 0x1a4   : > { %v859_v6 = vpop.f32.mrf.mxu0 }
 0x1a5   : > { %v1012_v60 = vmax.f32 %v987_v21, 0.0  ;;  %v860_v61 = vadd.f32 %v859_v6, %v795_v3 }
 0x1a6   : > { %v924_v8 = vpop.f32.mrf.mxu1 }
 0x1a7   : > { %1444 = vmatmul.msk.f32.gmra.mxu3 %vm1024_vm0, %v1012_v60  ;;  %v925_v30 = vadd.f32 %v924_v8, %v860_v61 }
 0x1aa   : > { %v989_v12 = vpop.f32.mrf.mxu2 }
 0x1ab   : > { %v990_v43 = vadd.f32 %v989_v12, %v925_v30 }
 0x1ac   : > { %v862_v14 = vpop.f32.mrf.mxu0 }
 0x1ad   : > { %v1013_v0 = vmax.f32 %v990_v43, 0.0  ;;  %v863_v17 = vadd.f32 %v862_v14, %v798_v25 }
 0x1ae   : > { %v927_v18 = vpop.f32.mrf.mxu1 }
 0x1af   : > { %1445 = vmatmul.msk.f32.gmra.mxu3 %vm1024_vm0, %v1013_v0  ;;  %v928_v42 = vadd.f32 %v927_v18, %v863_v17 }
 0x1b2   : > { %v992_v28 = vpop.f32.mrf.mxu2 }
 0x1b3   : > { %v993_v23 = vadd.f32 %v992_v28, %v928_v42 }
 0x1b4   : > { %v865_v24 = vpop.f32.mrf.mxu0 }
 0x1b5   : > { %v1014_v29 = vmax.f32 %v993_v23, 0.0  ;;  %v866_v2 = vadd.f32 %v865_v24, %v801_v34 }
 0x1b6   : > { %v930_v4 = vpop.f32.mrf.mxu1 }
 0x1b7   : > { %1446 = vmatmul.msk.f32.gmra.mxu3 %vm1024_vm0, %v1014_v29  ;;  %v931_v31 = vadd.f32 %v930_v4, %v866_v2 }
 0x1ba   : > { %v995_v32 = vpop.f32.mrf.mxu2 }
 0x1bb   : > { %v996_v5 = vadd.f32 %v995_v32, %v931_v31 }
 0x1bc   : > { %v868_v36 = vpop.f32.mrf.mxu0 }
 0x1bd   : > { %v1015_v33 = vmax.f32 %v996_v5, 0.0  ;;  %v869_v7 = vadd.f32 %v868_v36, %v804_v35 }
 0x1be   : > { %v933_v37 = vpop.f32.mrf.mxu1 }
 0x1bf   : > { %1447 = vmatmul.msk.f32.gmra.mxu3 %vm1024_vm0, %v1015_v33  ;;  %v934_v20 = vadd.f32 %v933_v37, %v869_v7 }
 0x1c2   : > { %v998_v49 = vpop.f32.mrf.mxu2 }
 0x1c3   : > { %v999_v38 = vadd.f32 %v998_v49, %v934_v20 }
 0x1c5   : > { %v1016_v52 = vmax.f32 %v999_v38, 0.0 }
 0x1c7   : > { %1448 = vmatmul.msk.f32.gmra.mxu3 %vm1024_vm0, %v1016_v52 }
 0x1d2   : > { %v1090_v40 = vpop.f32.mrf.mxu3 }
 0x1d3   : > { %v2317_v9 = vadd.f32 %v2307_v45, %v1090_v40 }
 0x1d5   : > { %1139 = vst.msk [vmem:[%s2314_s27] sm:$0xff] %vm1138_vm1, %v2317_v9  ;;  %v1156_v10 = vmul.f32 0.5, %v2317_v9 }
 0x1d7   : > { %v1172_v41 = vmul.f32 1.442695, %v1156_v10 }
 0x1d9   : > { %1499 = vpow2.f32 %v1172_v41 }
 0x1da   : > { %v1093_v46 = vpop.f32.mrf.mxu3 }
 0x1db   : > { %v2324_v39 = vadd.f32 %v2307_v45, %v1093_v46 }
 0x1dd   : > { %1140 = vst.msk [vmem:[%s2314_s27 + $0x8] sm:$0xff] %vm1138_vm1, %v2324_v39  ;;  %v1157_v44 = vmul.f32 0.5, %v2324_v39 }
 0x1df   : > { %v1500_v47 = vpop.eup %1499  ;;  %v1174_v13 = vmul.f32 1.442695, %v1157_v44 }
 0x1e0   : > { %1223 = vrot.lane.b32.xlu0 %v1500_v47, %s1599_s28 }
 0x1e1   : > { %1501 = vpow2.f32 %v1174_v13 }
 0x1e2   : > { %v1096_v48 = vpop.f32.mrf.mxu3 }
 0x1e3   : > { %v2332_v50 = vadd.f32 %v2307_v45, %v1096_v48 }
 0x1e5   : > { %1141 = vst.msk [vmem:[%s2314_s27 + $0x10] sm:$0xff] %vm1138_vm1, %v2332_v50  ;;  %v1158_v54 = vmul.f32 0.5, %v2332_v50 }
 0x1e7   : > { %v1502_v55 = vpop.eup %1501  ;;  %v1176_v15 = vmul.f32 1.442695, %v1158_v54 }
 0x1e8   : > { %1225 = vrot.lane.b32.xlu0 %v1502_v55, %s1599_s28 }
 0x1e9   : > { %1503 = vpow2.f32 %v1176_v15 }
 0x1ea   : > { %v1099_v16 = vpop.f32.mrf.mxu3 }
 0x1eb   : > { %v2340_v57 = vadd.f32 %v2307_v45, %v1099_v16 }
 0x1ed   : > { %1142 = vst.msk [vmem:[%s2314_s27 + $0x18] sm:$0xff] %vm1138_vm1, %v2340_v57  ;;  %v1159_v53 = vmul.f32 0.5, %v2340_v57 }
 0x1ef   : > { %v1504_v56 = vpop.eup %1503  ;;  %v1178_v62 = vmul.f32 1.442695, %v1159_v53 }
 0x1f0   : > { %1227 = vrot.lane.b32.xlu1 %v1504_v56, %s1599_s28 }
 0x1f1   : > { %1505 = vpow2.f32 %v1178_v62 }
 0x1f2   : > { %v1102_v51 = vpop.f32.mrf.mxu3 }
 0x1f3   : > { %v2348_v63 = vadd.f32 %v2307_v45, %v1102_v51 }
 0x1f5   : > { %1143 = vst.msk [vmem:[%s2314_s27 + $0x20] sm:$0xff] %vm1138_vm1, %v2348_v63  ;;  %v1160_v19 = vmul.f32 0.5, %v2348_v63 }
 0x1f7   : > { %v1506_v26 = vpop.eup %1505  ;;  %v1180_v58 = vmul.f32 1.442695, %v1160_v19  ;;  %v2445_v19 = vld [vmem:[%s2538_s5] ss:$0 sm:$0xff] }
 0x1f8   : > { %1229 = vrot.lane.b32.xlu1 %v1506_v26, %s1599_s28 }
 0x1f9   : > { %1507 = vpow2.f32 %v1180_v58 }
 0x1fa   : > { %v1105_v11 = vpop.f32.mrf.mxu3 }
 0x1fb   : > { %v2356_v1 = vadd.f32 %v2307_v45, %v1105_v11 }
 0x1fd   : > { %1144 = vst.msk [vmem:[%s2314_s27 + $0x28] sm:$0xff] %vm1138_vm1, %v2356_v1  ;;  %v1161_v3 = vmul.f32 0.5, %v2356_v1 }
 0x1ff   : > { %v1508_v21 = vpop.eup %1507  ;;  %v1182_v22 = vmul.f32 1.442695, %v1161_v3 }
 0x200   : > { %1231 = vrot.lane.b32.xlu2 %v1508_v21, %s1599_s28 }
 0x201   : > { %1509 = vpow2.f32 %v1182_v22 }
 0x202   : > { %v1108_v6 = vpop.f32.mrf.mxu3 }
 0x203   : > { %v2364_v60 = vadd.f32 %v2307_v45, %v1108_v6 }
 0x205   : > { %1145 = vst.msk [vmem:[%s2314_s27 + $0x30] sm:$0xff] %vm1138_vm1, %v2364_v60  ;;  %v1162_v61 = vmul.f32 0.5, %v2364_v60 }
 0x207   : > { %v1510_v8 = vpop.eup %1509  ;;  %v1184_v30 = vmul.f32 1.442695, %v1162_v61 }
 0x208   : > { %1233 = vrot.lane.b32.xlu2 %v1510_v8, %s1599_s28 }
 0x209   : > { %1511 = vpow2.f32 %v1184_v30 }
 0x20a   : > { %v1111_v12 = vpop.f32.mrf.mxu3 }
 0x20b   : > { %v2372_v25 = vadd.f32 %v2307_v45, %v1111_v12 }
 0x20d   : > { %1146 = vst.msk [vmem:[%s2314_s27 + $0x38] sm:$0xff] %vm1138_vm1, %v2372_v25  ;;  %v1163_v43 = vmul.f32 0.5, %v2372_v25 }
 0x20f   : > { %v1512_v14 = vpop.eup %1511  ;;  %v1186_v0 = vmul.f32 1.442695, %v1163_v43 }
 0x210   : > { %1235 = vrot.lane.b32.xlu0 %v1512_v14, %s1599_s28 }
 0x211   : > { %1513 = vpow2.f32 %v1186_v0 }
 0x212   : > { %v1114_v17 = vpop.f32.mrf.mxu3 }
 0x213   : > { %v2380_v27 = vadd.f32 %v2307_v45, %v1114_v17 }
 0x215   : > { %1147 = vst.msk [vmem:[%s2314_s27 + $0x40] sm:$0xff] %vm1138_vm1, %v2380_v27  ;;  %v1164_v18 = vmul.f32 0.5, %v2380_v27 }
 0x217   : > { %v1514_v42 = vpop.eup %1513  ;;  %v1188_v28 = vmul.f32 1.442695, %v1164_v18 }
 0x218   : > { %1237 = vrot.lane.b32.xlu1 %v1514_v42, %s1599_s28 }
 0x219   : > { %1515 = vpow2.f32 %v1188_v28 }
 0x21a   : > { %v1117_v34 = vpop.f32.mrf.mxu3 }
 0x21b   : > { %v2388_v23 = vadd.f32 %v2307_v45, %v1117_v34 }
 0x21d   : > { %1148 = vst.msk [vmem:[%s2314_s27 + $0x48] sm:$0xff] %vm1138_vm1, %v2388_v23  ;;  %v1165_v24 = vmul.f32 0.5, %v2388_v23 }
 0x21f   : > { %v1516_v29 = vpop.eup %1515  ;;  %v1190_v2 = vmul.f32 1.442695, %v1165_v24 }
 0x220   : > { %1239 = vrot.lane.b32.xlu2 %v1516_v29, %s1599_s28 }
 0x221   : > { %1517 = vpow2.f32 %v1190_v2 }
 0x222   : > { %v1120_v4 = vpop.f32.mrf.mxu3 }
 0x223   : > { %v2396_v59 = vadd.f32 %v2307_v45, %v1120_v4 }
 0x225   : > { %1149 = vst.msk [vmem:[%s2314_s27 + $0x50] sm:$0xff] %vm1138_vm1, %v2396_v59  ;;  %v1166_v31 = vmul.f32 0.5, %v2396_v59 }
 0x227   : > { %v1518_v32 = vpop.eup %1517  ;;  %v1192_v35 = vmul.f32 1.442695, %v1166_v31 }
 0x228   : > { %1241 = vrot.lane.b32.xlu0 %v1518_v32, %s1599_s28 }
 0x229   : > { %1519 = vpow2.f32 %v1192_v35 }
 0x22a   : > { %v1123_v5 = vpop.f32.mrf.mxu3 }
 0x22b   : > { %v2404_v36 = vadd.f32 %v2307_v45, %v1123_v5 }
 0x22d   : > { %1150 = vst.msk [vmem:[%s2314_s27 + $0x58] sm:$0xff] %vm1138_vm1, %v2404_v36  ;;  %v1167_v33 = vmul.f32 0.5, %v2404_v36 }
 0x22f   : > { %v1520_v7 = vpop.eup %1519  ;;  %v1194_v37 = vmul.f32 1.442695, %v1167_v33 }
 0x230   : > { %1243 = vrot.lane.b32.xlu1 %v1520_v7, %s1599_s28 }
 0x231   : > { %1521 = vpow2.f32 %v1194_v37 }
 0x232   : > { %v1126_v20 = vpop.f32.mrf.mxu3 }
 0x233   : > { %v2412_v49 = vadd.f32 %v2307_v45, %v1126_v20 }
 0x235   : > { %1151 = vst.msk [vmem:[%s2314_s27 + $0x60] sm:$0xff] %vm1138_vm1, %v2412_v49  ;;  %v1168_v38 = vmul.f32 0.5, %v2412_v49 }
 0x237   : > { %v1522_v52 = vpop.eup %1521  ;;  %v1196_v40 = vmul.f32 1.442695, %v1168_v38 }
 0x238   : > { %1245 = vrot.lane.b32.xlu2 %v1522_v52, %s1599_s28 }
 0x239   : > { %1523 = vpow2.f32 %v1196_v40 }
 0x23a   : > { %v1129_v10 = vpop.f32.mrf.mxu3 }
 0x23b   : > { %v2420_v41 = vadd.f32 %v2307_v45, %v1129_v10 }
 0x23d   : > { %1152 = vst.msk [vmem:[%s2314_s27 + $0x68] sm:$0xff] %vm1138_vm1, %v2420_v41  ;;  %v1169_v46 = vmul.f32 0.5, %v2420_v41 }
 0x23f   : > { %v1524_v44 = vpop.eup %1523  ;;  %v1198_v47 = vmul.f32 1.442695, %v1169_v46 }
 0x240   : > { %1247 = vrot.lane.b32.xlu0 %v1524_v44, %s1599_s28 }
 0x241   : > { %1525 = vpow2.f32 %v1198_v47 }
 0x242   : > { %v1132_v13 = vpop.f32.mrf.mxu3 }
 0x243   : > { %v2428_v48 = vadd.f32 %v2307_v45, %v1132_v13 }
 0x245   : > { %1153 = vst.msk [vmem:[%s2314_s27 + $0x70] sm:$0xff] %vm1138_vm1, %v2428_v48  ;;  %v1170_v54 = vmul.f32 0.5, %v2428_v48 }
 0x247   : > { %v1526_v55 = vpop.eup %1525  ;;  %v1200_v15 = vmul.f32 1.442695, %v1170_v54 }
 0x248   : > { %1249 = vrot.lane.b32.xlu1 %v1526_v55, %s1599_s28 }
 0x249   : > { %1527 = vpow2.f32 %v1200_v15 }
 0x24a   : > { %v1135_v16 = vpop.f32.mrf.mxu3 }
 0x24b   : > { %v2436_v53 = vadd.f32 %v2307_v45, %v1135_v16 }
 0x24d   : > { %1154 = vst.msk [vmem:[%s2314_s27 + $0x78] sm:$0xff] %vm1138_vm1, %v2436_v53  ;;  %v1171_v56 = vmul.f32 0.5, %v2436_v53 }
 0x24f   : > { %v1528_v62 = vpop.eup %1527  ;;  %v1202_v51 = vmul.f32 1.442695, %v1171_v56 }
 0x250   : > { %1251 = vrot.lane.b32.xlu2 %v1528_v62, %s1599_s28 }
 0x251   : > { %1529 = vpow2.f32 %v1202_v51 }
 0x252   : > { %v1224_v26 = vpop.permute.xlu0 %1223 }
 0x253   : > { %v1271_v58 = vmul.f32 %v2445_v19, %v1224_v26 }
 0x255   : > { %v1287_v45 = vadd.f32 %v1271_v58, %v2317_v9 }
 0x257   : > { %v1530_v11 = vpop.eup %1529  ;;  %1304 = vst.msk [vmem:[%s2454_s24] sm:$0xff] %vm1303_vm2, %v1287_v45 }
 0x258   : > { %1253 = vrot.lane.b32.xlu0 %v1530_v11, %s1599_s28 }
 0x25a   : > { %v1232_v3 = vpop.permute.xlu2 %1231  ;;  %v1226_v21 = vpop.permute.xlu0 %1225 }
 0x25b   : > { %v1275_v22 = vmul.f32 %v2445_v19, %v1232_v3  ;;  %v1272_v6 = vmul.f32 %v2445_v19, %v1226_v21 }
 0x25d   : > { %v1291_v61 = vadd.f32 %v1275_v22, %v2348_v63  ;;  %v1288_v8 = vadd.f32 %v1272_v6, %v2324_v39 }
 0x25f   : > { %1308 = vst.msk [vmem:[%s2454_s24 + $0x20] sm:$0xff] %vm1303_vm2, %v1291_v61 }
 0x260   : > { %1305 = vst.msk [vmem:[%s2454_s24 + $0x8] sm:$0xff] %vm1303_vm2, %v1288_v8 }
 0x262   : > { %v1234_v9 = vpop.permute.xlu2 %1233  ;;  %v1228_v30 = vpop.permute.xlu1 %1227 }
 0x263   : > { %v1276_v12 = vmul.f32 %v2445_v19, %v1234_v9  ;;  %v1273_v43 = vmul.f32 %v2445_v19, %v1228_v30 }
 0x265   : > { %v1292_v14 = vadd.f32 %v1276_v12, %v2356_v1  ;;  %v1289_v0 = vadd.f32 %v1273_v43, %v2332_v50 }
 0x267   : > { %1309 = vst.msk [vmem:[%s2454_s24 + $0x28] sm:$0xff] %vm1303_vm2, %v1292_v14 }
 0x268   : > { %1306 = vst.msk [vmem:[%s2454_s24 + $0x10] sm:$0xff] %vm1303_vm2, %v1289_v0 }
 0x26a   : > { %v1230_v39 = vpop.permute.xlu1 %1229 }
 0x26b   : > { %v1274_v63 = vmul.f32 %v2445_v19, %v1230_v39 }
 0x26d   : > { %v1290_v17 = vadd.f32 %v1274_v63, %v2340_v57 }
 0x26f   : > { %1307 = vst.msk [vmem:[%s2454_s24 + $0x18] sm:$0xff] %vm1303_vm2, %v1290_v17 }
 0x27a   : > { %v1240_v18 = vpop.permute.xlu2 %1239 }
 0x27b   : > { %v1279_v42 = vmul.f32 %v2445_v19, %v1240_v18 }
 0x27d   : > { %v1295_v1 = vadd.f32 %v1279_v42, %v2380_v27 }
 0x27f   : > { %1312 = vst.msk [vmem:[%s2454_s24 + $0x40] sm:$0xff] %vm1303_vm2, %v1295_v1 }
 0x282   : > { %v1236_v50 = vpop.permute.xlu0 %1235 }
 0x283   : > { %v1277_v28 = vmul.f32 %v2445_v19, %v1236_v50 }
 0x285   : > { %v1293_v34 = vadd.f32 %v1277_v28, %v2364_v60 }
 0x287   : > { %1310 = vst.msk [vmem:[%s2454_s24 + $0x30] sm:$0xff] %vm1303_vm2, %v1293_v34 }
 0x28a   : > { %v1238_v57 = vpop.permute.xlu1 %1237 }
 0x28b   : > { %v1278_v24 = vmul.f32 %v2445_v19, %v1238_v57 }
 0x28d   : > { %v1294_v29 = vadd.f32 %v1278_v24, %v2372_v25 }
 0x28f   : > { %1311 = vst.msk [vmem:[%s2454_s24 + $0x38] sm:$0xff] %vm1303_vm2, %v1294_v29 }
 0x292   : > { %v1246_v27 = vpop.permute.xlu2 %1245 }
 0x293   : > { %v1282_v2 = vmul.f32 %v2445_v19, %v1246_v27 }
 0x295   : > { %v1298_v4 = vadd.f32 %v1282_v2, %v2404_v36 }
 0x297   : > { %1315 = vst.msk [vmem:[%s2454_s24 + $0x58] sm:$0xff] %vm1303_vm2, %v1298_v4 }
 0x29a   : > { %v1242_v60 = vpop.permute.xlu0 %1241 }
 0x29b   : > { %v1280_v31 = vmul.f32 %v2445_v19, %v1242_v60 }
 0x29d   : > { %v1296_v32 = vadd.f32 %v1280_v31, %v2388_v23 }
 0x29f   : > { %1313 = vst.msk [vmem:[%s2454_s24 + $0x48] sm:$0xff] %vm1303_vm2, %v1296_v32 }
 0x2a2   : > { %v1244_v25 = vpop.permute.xlu1 %1243 }
 0x2a3   : > { %v1281_v35 = vmul.f32 %v2445_v19, %v1244_v25 }
 0x2a5   : > { %v1297_v5 = vadd.f32 %v1281_v35, %v2396_v59 }
 0x2a7   : > { %1314 = vst.msk [vmem:[%s2454_s24 + $0x50] sm:$0xff] %vm1303_vm2, %v1297_v5 }
 0x2aa   : > { %v1252_v36 = vpop.permute.xlu2 %1251 }
 0x2ab   : > { %v1285_v33 = vmul.f32 %v2445_v19, %v1252_v36 }
 0x2ad   : > { %v1301_v7 = vadd.f32 %v1285_v33, %v2428_v48 }
 0x2af   : > { %1318 = vst.msk [vmem:[%s2454_s24 + $0x70] sm:$0xff] %vm1303_vm2, %v1301_v7 }
 0x2b2   : > { %v1248_v37 = vpop.permute.xlu0 %1247 }
 0x2b3   : > { %v1283_v23 = vmul.f32 %v2445_v19, %v1248_v37 }
 0x2b5   : > { %v1299_v20 = vadd.f32 %v1283_v23, %v2412_v49 }
 0x2b7   : > { %1316 = vst.msk [vmem:[%s2454_s24 + $0x60] sm:$0xff] %vm1303_vm2, %v1299_v20 }
 0x2ba   : > { %v1250_v38 = vpop.permute.xlu1 %1249 }
 0x2bb   : > { %v1284_v59 = vmul.f32 %v2445_v19, %v1250_v38 }
 0x2bd   : > { %v1300_v52 = vadd.f32 %v1284_v59, %v2420_v41 }
 0x2bf   : > { %1317 = vst.msk [vmem:[%s2454_s24 + $0x68] sm:$0xff] %vm1303_vm2, %v1300_v52 }
 0x2ca   : > { %v1254_v40 = vpop.permute.xlu0 %1253 }
 0x2cb   : > { %v1286_v10 = vmul.f32 %v2445_v19, %v1254_v40 }
 0x2cd   : > { %v1302_v46 = vadd.f32 %v1286_v10, %v2436_v53 }
 0x2cf   : > { %1319 = vst.msk [vmem:[%s2454_s24 + $0x78] sm:$0xff] %vm1303_vm2, %v1302_v46 }
 0x2d0 PF: > { %p18_p7 = scmp.ge.s32.totalorder %s1660_s29, 4   ;;  %s2543_s24 = smov %s1587_s25 }
 0x2d1   : > { %s2544_s25 = smov %s1591_s26  ;;  %s2545_s26 = smov %s1670_s9 }
 0x2d2   : > { %s2546_s27 = smov %s1660_s29  ;;  %20 = sbr.rel (!%p18_p7) target bundleno = 3 (0x3), region = 96 }
 0x2d7   :  { %1359 = vsyncpa [#allocation3], 1 }
 0x2d8   :  { %1361 = vsyncpa [#allocation3 + $0x1], 1 }

</bundles_post_ra>
